<compile_context>
chip_gen: v5e
topology: v5e:2x2
jax: 0.10.0
libtpu: 0.0.40
codegen_flags: <defaults>
</compile_context>

<pallas_src>
import math
import functools

import jax
import jax.numpy as jnp
from jax.experimental import pallas as pl
from jax.experimental.pallas import tpu as pltpu

_NEG = -1e30                       # finite "minus infinity" for the causal mask
_VMEM_LIMIT = 48 * 1024 * 1024     # < v7x 64 MiB physical, generous elsewhere


def _cparams(sems):
    return pltpu.CompilerParams(dimension_semantics=sems,
                                vmem_limit_bytes=_VMEM_LIMIT)


def _seq_tile(T, pref=256):
    if T <= pref:
        return T
    for t in (pref, 128, 64, 32, 16, 8):
        if T % t == 0:
            return t
    return T


# ----------------------------- in-kernel helpers -----------------------------

def _layernorm(x, w, b, eps=1e-5):
    mu = jnp.mean(x, axis=-1, keepdims=True)
    var = jnp.mean((x - mu) ** 2, axis=-1, keepdims=True)
    return (x - mu) * jax.lax.rsqrt(var + eps) * w + b


def _gelu_tanh(x):
    # matches torch.nn.GELU(approximate='tanh')
    c = math.sqrt(2.0 / math.pi)
    return 0.5 * x * (1.0 + jnp.tanh(c * (x + 0.044715 * x * x * x)))


# ------------------------------ kernel bodies --------------------------------

def _ln_qkv_kernel(C, x_ref, w_ref, b_ref, wqkv_ref, bqkv_ref,
                   hln_ref, q_ref, k_ref, v_ref):
    # x_ref: (1, tm, C) bf16; wqkv: (C, 3C) bf16 (q-part pre-scaled by 1/sqrt(hd))
    bf = jnp.bfloat16
    xf = x_ref[0].astype(jnp.float32)
    h = _layernorm(xf, w_ref[...], b_ref[...])
    h_bf = h.astype(bf)
    hln_ref[0] = h_bf
    # Three (tm,C)x(C,C) matmuls: smaller live values than one (tm,3C) result,
    # and each output is stored straight to its lane-dense (B,T,C) array.
    for n, o_ref in enumerate((q_ref, k_ref, v_ref)):
        w = wqkv_ref[:, n * C:(n + 1) * C]
        bias = bqkv_ref[:, n * C:(n + 1) * C]
        o_ref[0] = (jnp.dot(h_bf, w, preferred_element_type=jnp.float32)
                    + bias).astype(bf)


def _attn_kernel(n_head, hd, tq, tkv,
                 hln_ref, q_ref, k_ref, v_ref, wp_ref, bp_ref,
                 o_ref, m_ref, l_ref, acc_ref):
    # Flash-style causal attention with fused c_proj + residual.
    #   hln/q: (1, tq, C) bf16, k/v: (1, tkv, C) bf16, wp: (H, hd, C) bf16
    #   scratch: m/l (H, tq, 1) f32, acc (H, tq, hd) f32
    bf = jnp.bfloat16
    kv = pl.program_id(2)
    nkv = pl.num_programs(2)
    q0 = pl.program_id(1) * tq
    k0 = kv * tkv

    @pl.when(kv == 0)
    def _init():
        m_ref[...] = jnp.full(m_ref.shape, _NEG, jnp.float32)
        l_ref[...] = jnp.zeros(l_ref.shape, jnp.float32)
        acc_ref[...] = jnp.zeros(acc_ref.shape, jnp.float32)

    # Skip kv blocks that are entirely above the causal diagonal (~2x FLOPs).
    @pl.when(k0 <= q0 + tq - 1)
    def _compute():
        row = q0 + jax.lax.broadcasted_iota(jnp.int32, (tq, tkv), 0)
        col = k0 + jax.lax.broadcasted_iota(jnp.int32, (tq, tkv), 1)
        causal = col <= row
        for h in range(n_head):                      # static unroll over heads
            sl = slice(h * hd, (h + 1) * hd)
            qh = q_ref[0, :, sl]                     # (tq, hd) bf16
            kh = k_ref[0, :, sl]                     # (tkv, hd) bf16
            vh = v_ref[0, :, sl]                     # (tkv, hd) bf16
            s = jax.lax.dot_general(qh, kh, (((1,), (1,)), ((), ())),
                                    preferred_element_type=jnp.float32)
            s = jnp.where(causal, s, _NEG)           # (tq, tkv) f32
            m_prev = m_ref[h]                        # (tq, 1)
            m_new = jnp.maximum(m_prev, jnp.max(s, axis=-1, keepdims=True))
            alpha = jnp.exp(m_prev - m_new)
            p = jnp.exp(s - m_new)
            l_ref[h] = alpha * l_ref[h] + jnp.sum(p, axis=-1, keepdims=True)
            acc_ref[h] = alpha * acc_ref[h] + jnp.dot(
                p.astype(bf), vh, preferred_element_type=jnp.float32)
            m_ref[h] = m_new

    @pl.when(kv == nkv - 1)
    def _finalize():
        # x = ln_1(x) + c_proj(attn) ; head merge happens implicitly in the
        # per-head (tq,hd)x(hd,C) projection sum -> lane-dense (tq, C) store.
        out = hln_ref[0].astype(jnp.float32) + bp_ref[...]
        for h in range(n_head):
            inv_l = pl.reciprocal(l_ref[h], approx=True)
            oh = (acc_ref[h] * inv_l).astype(bf)     # (tq, hd)
            out = out + jnp.dot(oh, wp_ref[h], preferred_element_type=jnp.float32)
        o_ref[0] = out.astype(o_ref.dtype)


def _mlp_kernel(x_ref, ln2w_ref, ln2b_ref, wfc_ref, bfc_ref, wmp_ref, bmp_ref,
                o_ref, h2_ref, acc_ref):
    # Tiled over the 4C hidden dim (grid axis 2, "arbitrary").
    #   x: (1, tm, C) bf16, wfc: (C, th) bf16, wmp: (th, C) bf16
    #   scratch: h2 (tm, C) f32 (ln_2 output, computed once), acc (tm, C) f32
    bf = jnp.bfloat16
    j = pl.program_id(2)
    nj = pl.num_programs(2)

    @pl.when(j == 0)
    def _init():
        xf = x_ref[0].astype(jnp.float32)
        h2_ref[...] = _layernorm(xf, ln2w_ref[...], ln2b_ref[...])
        acc_ref[...] = jnp.zeros(acc_ref.shape, jnp.float32)

    fc = jnp.dot(h2_ref[...].astype(bf), wfc_ref[...],
                 preferred_element_type=jnp.float32) + bfc_ref[...]
    fc = _gelu_tanh(fc)
    acc_ref[...] += jnp.dot(fc.astype(bf), wmp_ref[...],
                            preferred_element_type=jnp.float32)

    @pl.when(j == nj - 1)
    def _finalize():
        # x = ln_2(x) + mlp(ln_2(x))
        o_ref[0] = (h2_ref[...] + acc_ref[...] + bmp_ref[...]).astype(o_ref.dtype)


def _lnf_kernel(x_ref, w_ref, b_ref, o_ref):
    xf = x_ref[0].astype(jnp.float32)
    o_ref[0] = _layernorm(xf, w_ref[...], b_ref[...]).astype(o_ref.dtype)


def _lm_head_kernel(x_ref, w_ref, o_ref):
    o_ref[0] = jnp.dot(x_ref[0], w_ref[...], preferred_element_type=jnp.float32)


# ------------------------------ block forward --------------------------------

def block_forward(x, p, n_head):
    B, T, C = x.shape
    hd = C // n_head
    tm = _seq_tile(T)                 # 256 where possible (fills v6e/v7x MXU)
    nq = T // tm
    th = 512 if (4 * C) % 512 == 0 else 4 * C
    nh = (4 * C) // th
    bf = jnp.bfloat16

    # ---- ln_1 + QKV projection (lane-dense (B,T,C) q/k/v outputs) ----
    hln, q, k, v = pl.pallas_call(
        functools.partial(_ln_qkv_kernel, C),
        grid=(B, nq),
        in_specs=[
            pl.BlockSpec((1, tm, C), lambda b, i: (b, i, 0)),
            pl.BlockSpec((1, C), lambda b, i: (0, 0)),
            pl.BlockSpec((1, C), lambda b, i: (0, 0)),
            pl.BlockSpec((C, 3 * C), lambda b, i: (0, 0)),
            pl.BlockSpec((1, 3 * C), lambda b, i: (0, 0)),
        ],
        out_specs=tuple(pl.BlockSpec((1, tm, C), lambda b, i: (b, i, 0))
                        for _ in range(4)),
        out_shape=tuple(jax.ShapeDtypeStruct((B, T, C), bf) for _ in range(4)),
        compiler_params=_cparams(("parallel", "parallel")),
    )(x, p["ln1_w"], p["ln1_b"], p["w_qkv"], p["b_qkv"])

    # ---- flash attention (kv-tiled, causal block skip) + c_proj + residual ----
    x_attn = pl.pallas_call(
        functools.partial(_attn_kernel, n_head, hd, tm, tm),
        grid=(B, nq, nq),
        in_specs=[
            pl.BlockSpec((1, tm, C), lambda b, i, j: (b, i, 0)),   # hln (residual)
            pl.BlockSpec((1, tm, C), lambda b, i, j: (b, i, 0)),   # q
            pl.BlockSpec((1, tm, C), lambda b, i, j: (b, j, 0)),   # k
            pl.BlockSpec((1, tm, C), lambda b, i, j: (b, j, 0)),   # v
            pl.BlockSpec((n_head, hd, C), lambda b, i, j: (0, 0, 0)),
            pl.BlockSpec((1, C), lambda b, i, j: (0, 0)),
        ],
        out_specs=pl.BlockSpec((1, tm, C), lambda b, i, j: (b, i, 0)),
        out_shape=jax.ShapeDtypeStruct((B, T, C), bf),
        scratch_shapes=[
            pltpu.VMEM((n_head, tm, 1), jnp.float32),   # m
            pltpu.VMEM((n_head, tm, 1), jnp.float32),   # l
            pltpu.VMEM((n_head, tm, hd), jnp.float32),  # acc
        ],
        compiler_params=_cparams(("parallel", "parallel", "arbitrary")),
    )(hln, q, k, v, p["w_attp"], p["b_attp"])

    # ---- ln_2 + MLP (hidden-dim tiled) + residual ----
    out = pl.pallas_call(
        _mlp_kernel,
        grid=(B, nq, nh),
        in_specs=[
            pl.BlockSpec((1, tm, C), lambda b, i, j: (b, i, 0)),
            pl.BlockSpec((1, C), lambda b, i, j: (0, 0)),
            pl.BlockSpec((1, C), lambda b, i, j: (0, 0)),
            pl.BlockSpec((C, th), lambda b, i, j: (0, j)),
            pl.BlockSpec((1, th), lambda b, i, j: (0, j)),
            pl.BlockSpec((th, C), lambda b, i, j: (j, 0)),
            pl.BlockSpec((1, C), lambda b, i, j: (0, 0)),
        ],
        out_specs=pl.BlockSpec((1, tm, C), lambda b, i, j: (b, i, 0)),
        out_shape=jax.ShapeDtypeStruct((B, T, C), bf),
        scratch_shapes=[
            pltpu.VMEM((tm, C), jnp.float32),   # ln_2 output (computed once)
            pltpu.VMEM((tm, C), jnp.float32),   # mlp accumulator
        ],
        compiler_params=_cparams(("parallel", "parallel", "arbitrary")),
    )(x_attn, p["ln2_w"], p["ln2_b"], p["w_fc"], p["b_fc"], p["w_mp"], p["b_mp"])
    return out


# --------------------------- final ln_f + lm_head ----------------------------

def lnf_forward(x, w, b):
    B, T, C = x.shape
    tm = _seq_tile(T)
    return pl.pallas_call(
        _lnf_kernel,
        grid=(B, T // tm),
        in_specs=[pl.BlockSpec((1, tm, C), lambda bb, i: (bb, i, 0)),
                  pl.BlockSpec((1, C), lambda bb, i: (0, 0)),
                  pl.BlockSpec((1, C), lambda bb, i: (0, 0))],
        out_specs=pl.BlockSpec((1, tm, C), lambda bb, i: (bb, i, 0)),
        out_shape=jax.ShapeDtypeStruct((B, T, C), jnp.bfloat16),
        compiler_params=_cparams(("parallel", "parallel")),
    )(x, w, b)


def lm_head_forward(xn, w_lm, tile_v=2048):
    B, T, C = xn.shape
    V = w_lm.shape[1]
    tv = min(V, tile_v)
    nv = pl.cdiv(V, tv)
    tm = _seq_tile(T)
    return pl.pallas_call(
        _lm_head_kernel,
        grid=(B, T // tm, nv),
        in_specs=[pl.BlockSpec((1, tm, C), lambda bb, i, v: (bb, i, 0)),
                  pl.BlockSpec((C, tv), lambda bb, i, v: (0, v))],
        out_specs=pl.BlockSpec((1, tm, tv), lambda bb, i, v: (bb, i, v)),
        out_shape=jax.ShapeDtypeStruct((B, T, V), jnp.float32),
        compiler_params=_cparams(("parallel", "parallel", "parallel")),
    )(xn, w_lm)


# ------------------------------- full GPT model -------------------------------

def init_params(key, vocabsize, blocksize, n_layer, n_embd):
    """Master f32 parameters (standard GPT-2 layout)."""
    ks = jax.random.split(key, 2 + 6 * n_layer + 1)
    std = 0.02
    p = {
        "wte": jax.random.normal(ks[0], (vocabsize, n_embd), jnp.float32) * std,
        "wpe": jax.random.normal(ks[1], (blocksize, n_embd), jnp.float32) * std,
        "blocks": [],
        "lnf_w": jnp.ones((1, n_embd), jnp.float32),
        "lnf_b": jnp.zeros((1, n_embd), jnp.float32),
        "w_lm": jax.random.normal(ks[-1], (n_embd, vocabsize), jnp.float32) * std,
    }
    for l in range(n_layer):
        k = ks[2 + 6 * l: 2 + 6 * (l + 1)]
        p["blocks"].append({
            "ln1_w": jnp.ones((1, n_embd), jnp.float32),
            "ln1_b": jnp.zeros((1, n_embd), jnp.float32),
            "w_qkv": jax.random.normal(k[0], (n_embd, 3 * n_embd), jnp.float32) * std,
            "b_qkv": jnp.zeros((1, 3 * n_embd), jnp.float32),
            "w_attp": jax.random.normal(k[1], (n_embd, n_embd), jnp.float32) * std,
            "b_attp": jnp.zeros((1, n_embd), jnp.float32),
            "ln2_w": jnp.ones((1, n_embd), jnp.float32),
            "ln2_b": jnp.zeros((1, n_embd), jnp.float32),
            "w_fc": jax.random.normal(k[2], (n_embd, 4 * n_embd), jnp.float32) * std,
            "b_fc": jnp.zeros((1, 4 * n_embd), jnp.float32),
            "w_mp": jax.random.normal(k[3], (4 * n_embd, n_embd), jnp.float32) * std,
            "b_mp": jnp.zeros((1, n_embd), jnp.float32),
        })
    return p


def prepare_params(p, n_head):
    """One-time conversion to kernel layout: bf16 weights, 1/sqrt(hd) folded
    into the Q slice of w_qkv/b_qkv, c_proj weight reshaped to (H, hd, C)."""
    bf = jnp.bfloat16
    C = p["wte"].shape[1]
    hd = C // n_head
    scale = 1.0 / math.sqrt(hd)
    kp = {
        "wte": p["wte"], "wpe": p["wpe"],
        "lnf_w": p["lnf_w"], "lnf_b": p["lnf_b"],
        "w_lm": p["w_lm"].astype(bf),
        "blocks": [],
    }
    for blk in p["blocks"]:
        w_qkv = jnp.concatenate(
            [blk["w_qkv"][:, :C] * scale, blk["w_qkv"][:, C:]], axis=1).astype(bf)
        b_qkv = jnp.concatenate(
            [blk["b_qkv"][:, :C] * scale, blk["b_qkv"][:, C:]], axis=1)
        kp["blocks"].append({
            "ln1_w": blk["ln1_w"], "ln1_b": blk["ln1_b"],
            "w_qkv": w_qkv, "b_qkv": b_qkv,
            "w_attp": blk["w_attp"].reshape(n_head, hd, C).astype(bf),
            "b_attp": blk["b_attp"],
            "ln2_w": blk["ln2_w"], "ln2_b": blk["ln2_b"],
            "w_fc": blk["w_fc"].astype(bf), "b_fc": blk["b_fc"],
            "w_mp": blk["w_mp"].astype(bf), "b_mp": blk["b_mp"],
        })
    return kp


def gpt_forward(kparams, idx, n_head):
    B, T = idx.shape
    # glue: embedding gathers (no clean Pallas equivalent for the gather)
    tok = kparams["wte"][idx]
    pos = kparams["wpe"][jnp.arange(T)]
    x = (tok + pos[None]).astype(jnp.bfloat16)
    for blk in kparams["blocks"]:
        x = block_forward(x, blk, n_head)
    xn = lnf_forward(x, kparams["lnf_w"], kparams["lnf_b"])
    return lm_head_forward(xn, kparams["w_lm"])


# -------------------------- plain-JAX reference (check) -----------------------
# Mirrors the kernel's bf16-activation / bf16-matmul-input / f32-accumulate
# precision, but uses a completely different implementation path (full softmax,
# XLA head split/merge transposes).

def _ref_forward(kp, idx, n_head):
    bf, f32 = jnp.bfloat16, jnp.float32
    B, T = idx.shape
    C = kp["wte"].shape[1]
    hd = C // n_head

    def ln(x, w, b):
        mu = jnp.mean(x, -1, keepdims=True)
        var = jnp.mean((x - mu) ** 2, -1, keepdims=True)
        return (x - mu) * jax.lax.rsqrt(var + 1e-5) * w + b

    x = (kp["wte"][idx] + kp["wpe"][jnp.arange(T)][None]).astype(bf)
    for blk in kp["blocks"]:
        h = ln(x.astype(f32), blk["ln1_w"], blk["ln1_b"]).astype(bf)
        qkv = (jnp.dot(h, blk["w_qkv"], preferred_element_type=f32)
               + blk["b_qkv"]).astype(bf)
        q, k, v = jnp.split(qkv, 3, axis=-1)
        q = q.reshape(B, T, n_head, hd).transpose(0, 2, 1, 3)
        k = k.reshape(B, T, n_head, hd).transpose(0, 2, 1, 3)
        v = v.reshape(B, T, n_head, hd).transpose(0, 2, 1, 3)
        att = jnp.einsum("bhqd,bhkd->bhqk", q, k, preferred_element_type=f32)
        mask = jnp.tril(jnp.ones((T, T), bool))
        att = jnp.where(mask, att, _NEG)
        p = jax.nn.softmax(att, axis=-1).astype(bf)
        o = jnp.einsum("bhqk,bhkd->bhqd", p, v,
                       preferred_element_type=f32).astype(bf)
        o = o.transpose(0, 2, 1, 3).reshape(B, T, C)
        proj = jnp.dot(o, blk["w_attp"].reshape(C, C),
                       preferred_element_type=f32) + blk["b_attp"]
        x = (h.astype(f32) + proj).astype(bf)                  # x = ln1(x)+attn
        h2 = ln(x.astype(f32), blk["ln2_w"], blk["ln2_b"])
        fc = jnp.dot(h2.astype(bf), blk["w_fc"],
                     preferred_element_type=f32) + blk["b_fc"]
        fc = _gelu_tanh(fc)
        mlp = jnp.dot(fc.astype(bf), blk["w_mp"],
                      preferred_element_type=f32) + blk["b_mp"]
        x = (h2 + mlp).astype(bf)                              # x = ln2(x)+mlp
    xn = ln(x.astype(f32), kp["lnf_w"], kp["lnf_b"]).astype(bf)
    return jnp.dot(xn, kp["w_lm"], preferred_element_type=f32)


# ------------------------------------ main ------------------------------------

if __name__ == "__main__":
    # small config consistent with GPTConfig structure
    blocksize = 16
    vocabsize = 64
    n_layer = 2
    n_head = 4
    n_embd = 32
    B, T = 2, 8

    key = jax.random.PRNGKey(0)
    pkey, ikey = jax.random.split(key)
    master = init_params(pkey, vocabsize, blocksize, n_layer, n_embd)
    kparams = prepare_params(master, n_head)    # one-time bf16 / layout prep
    idx = jax.random.randint(ikey, (B, T), 0, vocabsize, dtype=jnp.int32)

    fwd = jax.jit(functools.partial(gpt_forward, n_head=n_head))
    logits = jax.block_until_ready(fwd(kparams, idx))
    assert logits.shape == (B, T, vocabsize)
    assert logits.dtype == jnp.float32

    ref = jax.block_until_ready(_ref_forward(kparams, idx, n_head))
    max_err = float(jnp.max(jnp.abs(logits - ref)))
    assert jnp.allclose(logits, ref, atol=2e-2, rtol=2e-2), max_err

    print("KERNEL_OK")
</pallas_src>

<mosaic_0001>
module attributes {stable_mosaic.version = 11 : i64} {
  func.func @_attn_kernel(%arg0: i32, %arg1: i32, %arg2: i32, %arg3: memref<1x8x32xbf16, #tpu.memory_space<vmem>>, %arg4: memref<1x8x32xbf16, #tpu.memory_space<vmem>>, %arg5: memref<1x8x32xbf16, #tpu.memory_space<vmem>>, %arg6: memref<1x8x32xbf16, #tpu.memory_space<vmem>>, %arg7: memref<4x8x32xbf16, #tpu.memory_space<vmem>>, %arg8: memref<1x32xf32, #tpu.memory_space<vmem>>, %arg9: memref<1x8x32xbf16, #tpu.memory_space<vmem>>, %arg10: memref<4x8x1xf32, #tpu.memory_space<vmem>>, %arg11: memref<4x8x1xf32, #tpu.memory_space<vmem>>, %arg12: memref<4x8x8xf32, #tpu.memory_space<vmem>>) attributes {dimension_semantics = [#tpu.dimension_semantics<parallel>, #tpu.dimension_semantics<parallel>, #tpu.dimension_semantics<arbitrary>], iteration_bounds = array<i64: 2, 1, 1>, scalar_prefetch = 0 : i64, scratch_operands = 3 : i64, tpu.core_type = #tpu.core_type<tc>, window_params = [{transform_indices = @transform_0, window_bounds = array<i64: 1, 8, 32>}, {transform_indices = @transform_1, window_bounds = array<i64: 1, 8, 32>}, {transform_indices = @transform_2, window_bounds = array<i64: 1, 8, 32>}, {transform_indices = @transform_3, window_bounds = array<i64: 1, 8, 32>}, {pipeline_mode = #tpu.pipeline_mode<synchronous>, transform_indices = @transform_4, window_bounds = array<i64: 4, 8, 32>}, {pipeline_mode = #tpu.pipeline_mode<synchronous>, transform_indices = @transform_5, window_bounds = array<i64: 1, 32>}, {transform_indices = @transform_6, window_bounds = array<i64: 1, 8, 32>}]} {
    %c8_i32 = arith.constant 8 : i32
    %0 = arith.muli %arg1, %c8_i32 : i32
    %c8_i32_0 = arith.constant 8 : i32
    %1 = arith.muli %arg2, %c8_i32_0 : i32
    %c0_i32 = arith.constant 0 : i32
    %2 = arith.cmpi eq, %arg2, %c0_i32 : i32
    %3 = arith.extui %2 : i1 to i32
    %c0_i32_1 = arith.constant 0 : i32
    %4 = arith.cmpi ne, %3, %c0_i32_1 : i32
    scf.if %4 {
      %cst = arith.constant -1.000000e+30 : f32
      %13 = vector.broadcast %cst : f32 to vector<4x8x1xf32>
      %c0 = arith.constant 0 : index
      %c0_6 = arith.constant 0 : index
      %c0_7 = arith.constant 0 : index
      %14 = vector.load %arg10[%c0, %c0_6, %c0_7] : memref<4x8x1xf32, #tpu.memory_space<vmem>>, vector<4x8x1xf32>
      tpu.vector_store %arg10[%c0, %c0_6, %c0_7], %13 {strides = array<i32>} : memref<4x8x1xf32, #tpu.memory_space<vmem>>, vector<4x8x1xf32>,
      %cst_8 = arith.constant 0.000000e+00 : f32
      %15 = vector.broadcast %cst_8 : f32 to vector<4x8x1xf32>
      %c0_9 = arith.constant 0 : index
      %c0_10 = arith.constant 0 : index
      %c0_11 = arith.constant 0 : index
      %16 = vector.load %arg11[%c0_9, %c0_10, %c0_11] : memref<4x8x1xf32, #tpu.memory_space<vmem>>, vector<4x8x1xf32>
      tpu.vector_store %arg11[%c0_9, %c0_10, %c0_11], %15 {strides = array<i32>} : memref<4x8x1xf32, #tpu.memory_space<vmem>>, vector<4x8x1xf32>,
      %cst_12 = arith.constant 0.000000e+00 : f32
      %17 = vector.broadcast %cst_12 : f32 to vector<4x8x8xf32>
      %c0_13 = arith.constant 0 : index
      %c0_14 = arith.constant 0 : index
      %c0_15 = arith.constant 0 : index
      %18 = vector.load %arg12[%c0_13, %c0_14, %c0_15] : memref<4x8x8xf32, #tpu.memory_space<vmem>>, vector<4x8x8xf32>
      tpu.vector_store %arg12[%c0_13, %c0_14, %c0_15], %17 {strides = array<i32>} : memref<4x8x8xf32, #tpu.memory_space<vmem>>, vector<4x8x8xf32>,
    } else {
    }
    %c8_i32_2 = arith.constant 8 : i32
    %5 = arith.addi %0, %c8_i32_2 : i32
    %c1_i32 = arith.constant 1 : i32
    %6 = arith.subi %5, %c1_i32 : i32
    %7 = arith.cmpi sle, %1, %6 : i32
    %8 = arith.extui %7 : i1 to i32
    %c0_i32_3 = arith.constant 0 : i32
    %9 = arith.cmpi ne, %8, %c0_i32_3 : i32
    scf.if %9 {
      %13 = tpu.iota {dimensions = array<i32: 0>} : vector<8x8xi32>
      %14 = vector.broadcast %0 : i32 to vector<8x8xi32>
      %15 = arith.addi %14, %13 : vector<8x8xi32>
      %16 = tpu.iota {dimensions = array<i32: 1>} : vector<8x8xi32>
      %17 = vector.broadcast %1 : i32 to vector<8x8xi32>
      %18 = arith.addi %17, %16 : vector<8x8xi32>
      %19 = arith.cmpi sle, %18, %15 : vector<8x8xi32>
      %c0 = arith.constant 0 : index
      %c0_6 = arith.constant 0 : index
      %c0_7 = arith.constant 0 : index
      %20 = vector.load %arg4[%c0, %c0_6, %c0_7] : memref<1x8x32xbf16, #tpu.memory_space<vmem>>, vector<1x8x8xbf16>
      %21 = vector.shape_cast %20 : vector<1x8x8xbf16> to vector<8x8xbf16>
      %c0_8 = arith.constant 0 : index
      %c0_9 = arith.constant 0 : index
      %c0_10 = arith.constant 0 : index
      %22 = vector.load %arg5[%c0_8, %c0_9, %c0_10] : memref<1x8x32xbf16, #tpu.memory_space<vmem>>, vector<1x8x8xbf16>
      %23 = vector.shape_cast %22 : vector<1x8x8xbf16> to vector<8x8xbf16>
      %c0_11 = arith.constant 0 : index
      %c0_12 = arith.constant 0 : index
      %c0_13 = arith.constant 0 : index
      %24 = vector.load %arg6[%c0_11, %c0_12, %c0_13] : memref<1x8x32xbf16, #tpu.memory_space<vmem>>, vector<1x8x8xbf16>
      %25 = vector.shape_cast %24 : vector<1x8x8xbf16> to vector<8x8xbf16>
      %cst = arith.constant dense<0.000000e+00> : vector<8x8xf32>
      %26 = tpu.matmul %21, %23, %cst {dimension_numbers = #tpu.dot_dimension_numbers<[1], [1], [0], [0], [0, 0, 1, 0], [], []>} : vector<8x8xbf16>, vector<8x8xbf16>, vector<8x8xf32> -> vector<8x8xf32>
      %cst_14 = arith.constant -1.000000e+30 : f32
      %27 = vector.broadcast %cst_14 : f32 to vector<8x8xf32>
      %28 = arith.select %19, %26, %27 : vector<8x8xi1>, vector<8x8xf32>
      %c0_15 = arith.constant 0 : index
      %c0_16 = arith.constant 0 : index
      %c0_17 = arith.constant 0 : index
      %29 = vector.load %arg10[%c0_15, %c0_16, %c0_17] : memref<4x8x1xf32, #tpu.memory_space<vmem>>, vector<1x8x1xf32>
      %30 = vector.shape_cast %29 : vector<1x8x1xf32> to vector<8x1xf32>
      %cst_18 = arith.constant dense<0xFF800000> : vector<8xf32>
      %31 = vector.multi_reduction <maximumf>, %28, %cst_18 [1] : vector<8x8xf32> to vector<8xf32>
      %32 = vector.shape_cast %31 : vector<8xf32> to vector<8x1xf32>
      %33 = arith.maximumf %30, %32 : vector<8x1xf32>
      %34 = arith.subf %30, %33 : vector<8x1xf32>
      %35 = math.exp %34 : vector<8x1xf32>
      %36 = vector.broadcast %33 : vector<8x1xf32> to vector<8x8xf32>
      %37 = arith.subf %28, %36 : vector<8x8xf32>
      %38 = math.exp %37 : vector<8x8xf32>
      %c0_19 = arith.constant 0 : index
      %c0_20 = arith.constant 0 : index
      %c0_21 = arith.constant 0 : index
      %39 = vector.load %arg11[%c0_19, %c0_20, %c0_21] : memref<4x8x1xf32, #tpu.memory_space<vmem>>, vector<1x8x1xf32>
      %40 = vector.shape_cast %39 : vector<1x8x1xf32> to vector<8x1xf32>
      %41 = arith.mulf %35, %40 : vector<8x1xf32>
      %cst_22 = arith.constant dense<0.000000e+00> : vector<8xf32>
      %42 = vector.multi_reduction <add>, %38, %cst_22 [1] : vector<8x8xf32> to vector<8xf32>
      %43 = vector.shape_cast %42 : vector<8xf32> to vector<8x1xf32>
      %44 = arith.addf %41, %43 : vector<8x1xf32>
      %c0_23 = arith.constant 0 : index
      %c0_24 = arith.constant 0 : index
      %c0_25 = arith.constant 0 : index
      %45 = vector.load %arg11[%c0_23, %c0_24, %c0_25] : memref<4x8x1xf32, #tpu.memory_space<vmem>>, vector<1x8x1xf32>
      %46 = vector.shape_cast %45 : vector<1x8x1xf32> to vector<8x1xf32>
      %47 = vector.shape_cast %44 : vector<8x1xf32> to vector<1x8x1xf32>
      tpu.vector_store %arg11[%c0_23, %c0_24, %c0_25], %47 {strides = array<i32>} : memref<4x8x1xf32, #tpu.memory_space<vmem>>, vector<1x8x1xf32>,
      %c0_26 = arith.constant 0 : index
      %c0_27 = arith.constant 0 : index
      %c0_28 = arith.constant 0 : index
      %48 = vector.load %arg12[%c0_26, %c0_27, %c0_28] : memref<4x8x8xf32, #tpu.memory_space<vmem>>, vector<1x8x8xf32>
      %49 = vector.shape_cast %48 : vector<1x8x8xf32> to vector<8x8xf32>
      %50 = vector.broadcast %35 : vector<8x1xf32> to vector<8x8xf32>
      %51 = arith.mulf %50, %49 : vector<8x8xf32>
      %52 = arith.truncf %38 : vector<8x8xf32> to vector<8x8xbf16>
      %cst_29 = arith.constant dense<0.000000e+00> : vector<8x8xf32>
      %53 = tpu.matmul %52, %25, %cst_29 {dimension_numbers = #tpu.dot_dimension_numbers<[1], [0], [0], [1], [0, 0, 1, 1], [], []>} : vector<8x8xbf16>, vector<8x8xbf16>, vector<8x8xf32> -> vector<8x8xf32>
      %54 = arith.addf %51, %53 : vector<8x8xf32>
      %c0_30 = arith.constant 0 : index
      %c0_31 = arith.constant 0 : index
      %c0_32 = arith.constant 0 : index
      %55 = vector.load %arg12[%c0_30, %c0_31, %c0_32] : memref<4x8x8xf32, #tpu.memory_space<vmem>>, vector<1x8x8xf32>
      %56 = vector.shape_cast %55 : vector<1x8x8xf32> to vector<8x8xf32>
      %57 = vector.shape_cast %54 : vector<8x8xf32> to vector<1x8x8xf32>
      tpu.vector_store %arg12[%c0_30, %c0_31, %c0_32], %57 {strides = array<i32>} : memref<4x8x8xf32, #tpu.memory_space<vmem>>, vector<1x8x8xf32>,
      %c0_33 = arith.constant 0 : index
      %c0_34 = arith.constant 0 : index
      %c0_35 = arith.constant 0 : index
      %58 = vector.load %arg10[%c0_33, %c0_34, %c0_35] : memref<4x8x1xf32, #tpu.memory_space<vmem>>, vector<1x8x1xf32>
      %59 = vector.shape_cast %58 : vector<1x8x1xf32> to vector<8x1xf32>
      %60 = vector.shape_cast %33 : vector<8x1xf32> to vector<1x8x1xf32>
      tpu.vector_store %arg10[%c0_33, %c0_34, %c0_35], %60 {strides = array<i32>} : memref<4x8x1xf32, #tpu.memory_space<vmem>>, vector<1x8x1xf32>,
      %c0_36 = arith.constant 0 : index
      %c0_37 = arith.constant 0 : index
      %c8 = arith.constant 8 : index
      %61 = vector.load %arg4[%c0_36, %c0_37, %c8] : memref<1x8x32xbf16, #tpu.memory_space<vmem>>, vector<1x8x8xbf16>
      %62 = vector.shape_cast %61 : vector<1x8x8xbf16> to vector<8x8xbf16>
      %c0_38 = arith.constant 0 : index
      %c0_39 = arith.constant 0 : index
      %c8_40 = arith.constant 8 : index
      %63 = vector.load %arg5[%c0_38, %c0_39, %c8_40] : memref<1x8x32xbf16, #tpu.memory_space<vmem>>, vector<1x8x8xbf16>
      %64 = vector.shape_cast %63 : vector<1x8x8xbf16> to vector<8x8xbf16>
      %c0_41 = arith.constant 0 : index
      %c0_42 = arith.constant 0 : index
      %c8_43 = arith.constant 8 : index
      %65 = vector.load %arg6[%c0_41, %c0_42, %c8_43] : memref<1x8x32xbf16, #tpu.memory_space<vmem>>, vector<1x8x8xbf16>
      %66 = vector.shape_cast %65 : vector<1x8x8xbf16> to vector<8x8xbf16>
      %cst_44 = arith.constant dense<0.000000e+00> : vector<8x8xf32>
      %67 = tpu.matmul %62, %64, %cst_44 {dimension_numbers = #tpu.dot_dimension_numbers<[1], [1], [0], [0], [0, 0, 1, 0], [], []>} : vector<8x8xbf16>, vector<8x8xbf16>, vector<8x8xf32> -> vector<8x8xf32>
      %cst_45 = arith.constant -1.000000e+30 : f32
      %68 = vector.broadcast %cst_45 : f32 to vector<8x8xf32>
      %69 = arith.select %19, %67, %68 : vector<8x8xi1>, vector<8x8xf32>
      %c1 = arith.constant 1 : index
      %c0_46 = arith.constant 0 : index
      %c0_47 = arith.constant 0 : index
      %70 = vector.load %arg10[%c1, %c0_46, %c0_47] : memref<4x8x1xf32, #tpu.memory_space<vmem>>, vector<1x8x1xf32>
      %71 = vector.shape_cast %70 : vector<1x8x1xf32> to vector<8x1xf32>
      %cst_48 = arith.constant dense<0xFF800000> : vector<8xf32>
      %72 = vector.multi_reduction <maximumf>, %69, %cst_48 [1] : vector<8x8xf32> to vector<8xf32>
      %73 = vector.shape_cast %72 : vector<8xf32> to vector<8x1xf32>
      %74 = arith.maximumf %71, %73 : vector<8x1xf32>
      %75 = arith.subf %71, %74 : vector<8x1xf32>
      %76 = math.exp %75 : vector<8x1xf32>
      %77 = vector.broadcast %74 : vector<8x1xf32> to vector<8x8xf32>
      %78 = arith.subf %69, %77 : vector<8x8xf32>
      %79 = math.exp %78 : vector<8x8xf32>
      %c1_49 = arith.constant 1 : index
      %c0_50 = arith.constant 0 : index
      %c0_51 = arith.constant 0 : index
      %80 = vector.load %arg11[%c1_49, %c0_50, %c0_51] : memref<4x8x1xf32, #tpu.memory_space<vmem>>, vector<1x8x1xf32>
      %81 = vector.shape_cast %80 : vector<1x8x1xf32> to vector<8x1xf32>
      %82 = arith.mulf %76, %81 : vector<8x1xf32>
      %cst_52 = arith.constant dense<0.000000e+00> : vector<8xf32>
      %83 = vector.multi_reduction <add>, %79, %cst_52 [1] : vector<8x8xf32> to vector<8xf32>
      %84 = vector.shape_cast %83 : vector<8xf32> to vector<8x1xf32>
      %85 = arith.addf %82, %84 : vector<8x1xf32>
      %c1_53 = arith.constant 1 : index
      %c0_54 = arith.constant 0 : index
      %c0_55 = arith.constant 0 : index
      %86 = vector.load %arg11[%c1_53, %c0_54, %c0_55] : memref<4x8x1xf32, #tpu.memory_space<vmem>>, vector<1x8x1xf32>
      %87 = vector.shape_cast %86 : vector<1x8x1xf32> to vector<8x1xf32>
      %88 = vector.shape_cast %85 : vector<8x1xf32> to vector<1x8x1xf32>
      tpu.vector_store %arg11[%c1_53, %c0_54, %c0_55], %88 {strides = array<i32>} : memref<4x8x1xf32, #tpu.memory_space<vmem>>, vector<1x8x1xf32>,
      %c1_56 = arith.constant 1 : index
      %c0_57 = arith.constant 0 : index
      %c0_58 = arith.constant 0 : index
      %89 = vector.load %arg12[%c1_56, %c0_57, %c0_58] : memref<4x8x8xf32, #tpu.memory_space<vmem>>, vector<1x8x8xf32>
      %90 = vector.shape_cast %89 : vector<1x8x8xf32> to vector<8x8xf32>
      %91 = vector.broadcast %76 : vector<8x1xf32> to vector<8x8xf32>
      %92 = arith.mulf %91, %90 : vector<8x8xf32>
      %93 = arith.truncf %79 : vector<8x8xf32> to vector<8x8xbf16>
      %cst_59 = arith.constant dense<0.000000e+00> : vector<8x8xf32>
      %94 = tpu.matmul %93, %66, %cst_59 {dimension_numbers = #tpu.dot_dimension_numbers<[1], [0], [0], [1], [0, 0, 1, 1], [], []>} : vector<8x8xbf16>, vector<8x8xbf16>, vector<8x8xf32> -> vector<8x8xf32>
      %95 = arith.addf %92, %94 : vector<8x8xf32>
      %c1_60 = arith.constant 1 : index
      %c0_61 = arith.constant 0 : index
      %c0_62 = arith.constant 0 : index
      %96 = vector.load %arg12[%c1_60, %c0_61, %c0_62] : memref<4x8x8xf32, #tpu.memory_space<vmem>>, vector<1x8x8xf32>
      %97 = vector.shape_cast %96 : vector<1x8x8xf32> to vector<8x8xf32>
      %98 = vector.shape_cast %95 : vector<8x8xf32> to vector<1x8x8xf32>
      tpu.vector_store %arg12[%c1_60, %c0_61, %c0_62], %98 {strides = array<i32>} : memref<4x8x8xf32, #tpu.memory_space<vmem>>, vector<1x8x8xf32>,
      %c1_63 = arith.constant 1 : index
      %c0_64 = arith.constant 0 : index
      %c0_65 = arith.constant 0 : index
      %99 = vector.load %arg10[%c1_63, %c0_64, %c0_65] : memref<4x8x1xf32, #tpu.memory_space<vmem>>, vector<1x8x1xf32>
      %100 = vector.shape_cast %99 : vector<1x8x1xf32> to vector<8x1xf32>
      %101 = vector.shape_cast %74 : vector<8x1xf32> to vector<1x8x1xf32>
      tpu.vector_store %arg10[%c1_63, %c0_64, %c0_65], %101 {strides = array<i32>} : memref<4x8x1xf32, #tpu.memory_space<vmem>>, vector<1x8x1xf32>,
      %c0_66 = arith.constant 0 : index
      %c0_67 = arith.constant 0 : index
      %c16 = arith.constant 16 : index
      %102 = vector.load %arg4[%c0_66, %c0_67, %c16] : memref<1x8x32xbf16, #tpu.memory_space<vmem>>, vector<1x8x8xbf16>
      %103 = vector.shape_cast %102 : vector<1x8x8xbf16> to vector<8x8xbf16>
      %c0_68 = arith.constant 0 : index
      %c0_69 = arith.constant 0 : index
      %c16_70 = arith.constant 16 : index
      %104 = vector.load %arg5[%c0_68, %c0_69, %c16_70] : memref<1x8x32xbf16, #tpu.memory_space<vmem>>, vector<1x8x8xbf16>
      %105 = vector.shape_cast %104 : vector<1x8x8xbf16> to vector<8x8xbf16>
      %c0_71 = arith.constant 0 : index
      %c0_72 = arith.constant 0 : index
      %c16_73 = arith.constant 16 : index
      %106 = vector.load %arg6[%c0_71, %c0_72, %c16_73] : memref<1x8x32xbf16, #tpu.memory_space<vmem>>, vector<1x8x8xbf16>
      %107 = vector.shape_cast %106 : vector<1x8x8xbf16> to vector<8x8xbf16>
      %cst_74 = arith.constant dense<0.000000e+00> : vector<8x8xf32>
      %108 = tpu.matmul %103, %105, %cst_74 {dimension_numbers = #tpu.dot_dimension_numbers<[1], [1], [0], [0], [0, 0, 1, 0], [], []>} : vector<8x8xbf16>, vector<8x8xbf16>, vector<8x8xf32> -> vector<8x8xf32>
      %cst_75 = arith.constant -1.000000e+30 : f32
      %109 = vector.broadcast %cst_75 : f32 to vector<8x8xf32>
      %110 = arith.select %19, %108, %109 : vector<8x8xi1>, vector<8x8xf32>
      %c2 = arith.constant 2 : index
      %c0_76 = arith.constant 0 : index
      %c0_77 = arith.constant 0 : index
      %111 = vector.load %arg10[%c2, %c0_76, %c0_77] : memref<4x8x1xf32, #tpu.memory_space<vmem>>, vector<1x8x1xf32>
      %112 = vector.shape_cast %111 : vector<1x8x1xf32> to vector<8x1xf32>
      %cst_78 = arith.constant dense<0xFF800000> : vector<8xf32>
      %113 = vector.multi_reduction <maximumf>, %110, %cst_78 [1] : vector<8x8xf32> to vector<8xf32>
      %114 = vector.shape_cast %113 : vector<8xf32> to vector<8x1xf32>
      %115 = arith.maximumf %112, %114 : vector<8x1xf32>
      %116 = arith.subf %112, %115 : vector<8x1xf32>
      %117 = math.exp %116 : vector<8x1xf32>
      %118 = vector.broadcast %115 : vector<8x1xf32> to vector<8x8xf32>
      %119 = arith.subf %110, %118 : vector<8x8xf32>
      %120 = math.exp %119 : vector<8x8xf32>
      %c2_79 = arith.constant 2 : index
      %c0_80 = arith.constant 0 : index
      %c0_81 = arith.constant 0 : index
      %121 = vector.load %arg11[%c2_79, %c0_80, %c0_81] : memref<4x8x1xf32, #tpu.memory_space<vmem>>, vector<1x8x1xf32>
      %122 = vector.shape_cast %121 : vector<1x8x1xf32> to vector<8x1xf32>
      %123 = arith.mulf %117, %122 : vector<8x1xf32>
      %cst_82 = arith.constant dense<0.000000e+00> : vector<8xf32>
      %124 = vector.multi_reduction <add>, %120, %cst_82 [1] : vector<8x8xf32> to vector<8xf32>
      %125 = vector.shape_cast %124 : vector<8xf32> to vector<8x1xf32>
      %126 = arith.addf %123, %125 : vector<8x1xf32>
      %c2_83 = arith.constant 2 : index
      %c0_84 = arith.constant 0 : index
      %c0_85 = arith.constant 0 : index
      %127 = vector.load %arg11[%c2_83, %c0_84, %c0_85] : memref<4x8x1xf32, #tpu.memory_space<vmem>>, vector<1x8x1xf32>
      %128 = vector.shape_cast %127 : vector<1x8x1xf32> to vector<8x1xf32>
      %129 = vector.shape_cast %126 : vector<8x1xf32> to vector<1x8x1xf32>
      tpu.vector_store %arg11[%c2_83, %c0_84, %c0_85], %129 {strides = array<i32>} : memref<4x8x1xf32, #tpu.memory_space<vmem>>, vector<1x8x1xf32>,
      %c2_86 = arith.constant 2 : index
      %c0_87 = arith.constant 0 : index
      %c0_88 = arith.constant 0 : index
      %130 = vector.load %arg12[%c2_86, %c0_87, %c0_88] : memref<4x8x8xf32, #tpu.memory_space<vmem>>, vector<1x8x8xf32>
      %131 = vector.shape_cast %130 : vector<1x8x8xf32> to vector<8x8xf32>
      %132 = vector.broadcast %117 : vector<8x1xf32> to vector<8x8xf32>
      %133 = arith.mulf %132, %131 : vector<8x8xf32>
      %134 = arith.truncf %120 : vector<8x8xf32> to vector<8x8xbf16>
      %cst_89 = arith.constant dense<0.000000e+00> : vector<8x8xf32>
      %135 = tpu.matmul %134, %107, %cst_89 {dimension_numbers = #tpu.dot_dimension_numbers<[1], [0], [0], [1], [0, 0, 1, 1], [], []>} : vector<8x8xbf16>, vector<8x8xbf16>, vector<8x8xf32> -> vector<8x8xf32>
      %136 = arith.addf %133, %135 : vector<8x8xf32>
      %c2_90 = arith.constant 2 : index
      %c0_91 = arith.constant 0 : index
      %c0_92 = arith.constant 0 : index
      %137 = vector.load %arg12[%c2_90, %c0_91, %c0_92] : memref<4x8x8xf32, #tpu.memory_space<vmem>>, vector<1x8x8xf32>
      %138 = vector.shape_cast %137 : vector<1x8x8xf32> to vector<8x8xf32>
      %139 = vector.shape_cast %136 : vector<8x8xf32> to vector<1x8x8xf32>
      tpu.vector_store %arg12[%c2_90, %c0_91, %c0_92], %139 {strides = array<i32>} : memref<4x8x8xf32, #tpu.memory_space<vmem>>, vector<1x8x8xf32>,
      %c2_93 = arith.constant 2 : index
      %c0_94 = arith.constant 0 : index
      %c0_95 = arith.constant 0 : index
      %140 = vector.load %arg10[%c2_93, %c0_94, %c0_95] : memref<4x8x1xf32, #tpu.memory_space<vmem>>, vector<1x8x1xf32>
      %141 = vector.shape_cast %140 : vector<1x8x1xf32> to vector<8x1xf32>
      %142 = vector.shape_cast %115 : vector<8x1xf32> to vector<1x8x1xf32>
      tpu.vector_store %arg10[%c2_93, %c0_94, %c0_95], %142 {strides = array<i32>} : memref<4x8x1xf32, #tpu.memory_space<vmem>>, vector<1x8x1xf32>,
      %c0_96 = arith.constant 0 : index
      %c0_97 = arith.constant 0 : index
      %c24 = arith.constant 24 : index
      %143 = vector.load %arg4[%c0_96, %c0_97, %c24] : memref<1x8x32xbf16, #tpu.memory_space<vmem>>, vector<1x8x8xbf16>
      %144 = vector.shape_cast %143 : vector<1x8x8xbf16> to vector<8x8xbf16>
      %c0_98 = arith.constant 0 : index
      %c0_99 = arith.constant 0 : index
      %c24_100 = arith.constant 24 : index
      %145 = vector.load %arg5[%c0_98, %c0_99, %c24_100] : memref<1x8x32xbf16, #tpu.memory_space<vmem>>, vector<1x8x8xbf16>
      %146 = vector.shape_cast %145 : vector<1x8x8xbf16> to vector<8x8xbf16>
      %c0_101 = arith.constant 0 : index
      %c0_102 = arith.constant 0 : index
      %c24_103 = arith.constant 24 : index
      %147 = vector.load %arg6[%c0_101, %c0_102, %c24_103] : memref<1x8x32xbf16, #tpu.memory_space<vmem>>, vector<1x8x8xbf16>
      %148 = vector.shape_cast %147 : vector<1x8x8xbf16> to vector<8x8xbf16>
      %cst_104 = arith.constant dense<0.000000e+00> : vector<8x8xf32>
      %149 = tpu.matmul %144, %146, %cst_104 {dimension_numbers = #tpu.dot_dimension_numbers<[1], [1], [0], [0], [0, 0, 1, 0], [], []>} : vector<8x8xbf16>, vector<8x8xbf16>, vector<8x8xf32> -> vector<8x8xf32>
      %cst_105 = arith.constant -1.000000e+30 : f32
      %150 = vector.broadcast %cst_105 : f32 to vector<8x8xf32>
      %151 = arith.select %19, %149, %150 : vector<8x8xi1>, vector<8x8xf32>
      %c3 = arith.constant 3 : index
      %c0_106 = arith.constant 0 : index
      %c0_107 = arith.constant 0 : index
      %152 = vector.load %arg10[%c3, %c0_106, %c0_107] : memref<4x8x1xf32, #tpu.memory_space<vmem>>, vector<1x8x1xf32>
      %153 = vector.shape_cast %152 : vector<1x8x1xf32> to vector<8x1xf32>
      %cst_108 = arith.constant dense<0xFF800000> : vector<8xf32>
      %154 = vector.multi_reduction <maximumf>, %151, %cst_108 [1] : vector<8x8xf32> to vector<8xf32>
      %155 = vector.shape_cast %154 : vector<8xf32> to vector<8x1xf32>
      %156 = arith.maximumf %153, %155 : vector<8x1xf32>
      %157 = arith.subf %153, %156 : vector<8x1xf32>
      %158 = math.exp %157 : vector<8x1xf32>
      %159 = vector.broadcast %156 : vector<8x1xf32> to vector<8x8xf32>
      %160 = arith.subf %151, %159 : vector<8x8xf32>
      %161 = math.exp %160 : vector<8x8xf32>
      %c3_109 = arith.constant 3 : index
      %c0_110 = arith.constant 0 : index
      %c0_111 = arith.constant 0 : index
      %162 = vector.load %arg11[%c3_109, %c0_110, %c0_111] : memref<4x8x1xf32, #tpu.memory_space<vmem>>, vector<1x8x1xf32>
      %163 = vector.shape_cast %162 : vector<1x8x1xf32> to vector<8x1xf32>
      %164 = arith.mulf %158, %163 : vector<8x1xf32>
      %cst_112 = arith.constant dense<0.000000e+00> : vector<8xf32>
      %165 = vector.multi_reduction <add>, %161, %cst_112 [1] : vector<8x8xf32> to vector<8xf32>
      %166 = vector.shape_cast %165 : vector<8xf32> to vector<8x1xf32>
      %167 = arith.addf %164, %166 : vector<8x1xf32>
      %c3_113 = arith.constant 3 : index
      %c0_114 = arith.constant 0 : index
      %c0_115 = arith.constant 0 : index
      %168 = vector.load %arg11[%c3_113, %c0_114, %c0_115] : memref<4x8x1xf32, #tpu.memory_space<vmem>>, vector<1x8x1xf32>
      %169 = vector.shape_cast %168 : vector<1x8x1xf32> to vector<8x1xf32>
      %170 = vector.shape_cast %167 : vector<8x1xf32> to vector<1x8x1xf32>
      tpu.vector_store %arg11[%c3_113, %c0_114, %c0_115], %170 {strides = array<i32>} : memref<4x8x1xf32, #tpu.memory_space<vmem>>, vector<1x8x1xf32>,
      %c3_116 = arith.constant 3 : index
      %c0_117 = arith.constant 0 : index
      %c0_118 = arith.constant 0 : index
      %171 = vector.load %arg12[%c3_116, %c0_117, %c0_118] : memref<4x8x8xf32, #tpu.memory_space<vmem>>, vector<1x8x8xf32>
      %172 = vector.shape_cast %171 : vector<1x8x8xf32> to vector<8x8xf32>
      %173 = vector.broadcast %158 : vector<8x1xf32> to vector<8x8xf32>
      %174 = arith.mulf %173, %172 : vector<8x8xf32>
      %175 = arith.truncf %161 : vector<8x8xf32> to vector<8x8xbf16>
      %cst_119 = arith.constant dense<0.000000e+00> : vector<8x8xf32>
      %176 = tpu.matmul %175, %148, %cst_119 {dimension_numbers = #tpu.dot_dimension_numbers<[1], [0], [0], [1], [0, 0, 1, 1], [], []>} : vector<8x8xbf16>, vector<8x8xbf16>, vector<8x8xf32> -> vector<8x8xf32>
      %177 = arith.addf %174, %176 : vector<8x8xf32>
      %c3_120 = arith.constant 3 : index
      %c0_121 = arith.constant 0 : index
      %c0_122 = arith.constant 0 : index
      %178 = vector.load %arg12[%c3_120, %c0_121, %c0_122] : memref<4x8x8xf32, #tpu.memory_space<vmem>>, vector<1x8x8xf32>
      %179 = vector.shape_cast %178 : vector<1x8x8xf32> to vector<8x8xf32>
      %180 = vector.shape_cast %177 : vector<8x8xf32> to vector<1x8x8xf32>
      tpu.vector_store %arg12[%c3_120, %c0_121, %c0_122], %180 {strides = array<i32>} : memref<4x8x8xf32, #tpu.memory_space<vmem>>, vector<1x8x8xf32>,
      %c3_123 = arith.constant 3 : index
      %c0_124 = arith.constant 0 : index
      %c0_125 = arith.constant 0 : index
      %181 = vector.load %arg10[%c3_123, %c0_124, %c0_125] : memref<4x8x1xf32, #tpu.memory_space<vmem>>, vector<1x8x1xf32>
      %182 = vector.shape_cast %181 : vector<1x8x1xf32> to vector<8x1xf32>
      %183 = vector.shape_cast %156 : vector<8x1xf32> to vector<1x8x1xf32>
      tpu.vector_store %arg10[%c3_123, %c0_124, %c0_125], %183 {strides = array<i32>} : memref<4x8x1xf32, #tpu.memory_space<vmem>>, vector<1x8x1xf32>,
    } else {
    }
    %c0_i32_4 = arith.constant 0 : i32
    %10 = arith.cmpi eq, %arg2, %c0_i32_4 : i32
    %11 = arith.extui %10 : i1 to i32
    %c0_i32_5 = arith.constant 0 : i32
    %12 = arith.cmpi ne, %11, %c0_i32_5 : i32
    scf.if %12 {
      %c0 = arith.constant 0 : index
      %c0_6 = arith.constant 0 : index
      %c0_7 = arith.constant 0 : index
      %13 = vector.load %arg3[%c0, %c0_6, %c0_7] : memref<1x8x32xbf16, #tpu.memory_space<vmem>>, vector<1x8x32xbf16>
      %14 = vector.shape_cast %13 : vector<1x8x32xbf16> to vector<8x32xbf16>
      %15 = arith.extf %14 : vector<8x32xbf16> to vector<8x32xf32>
      %c0_8 = arith.constant 0 : index
      %c0_9 = arith.constant 0 : index
      %16 = vector.load %arg8[%c0_8, %c0_9] : memref<1x32xf32, #tpu.memory_space<vmem>>, vector<1x32xf32>
      %17 = vector.broadcast %16 : vector<1x32xf32> to vector<8x32xf32>
      %18 = arith.addf %15, %17 : vector<8x32xf32>
      %c0_10 = arith.constant 0 : index
      %c0_11 = arith.constant 0 : index
      %c0_12 = arith.constant 0 : index
      %19 = vector.load %arg11[%c0_10, %c0_11, %c0_12] : memref<4x8x1xf32, #tpu.memory_space<vmem>>, vector<1x8x1xf32>
      %20 = vector.shape_cast %19 : vector<1x8x1xf32> to vector<8x1xf32>
      %21 = tpu.reciprocal %20 {approx = true} : vector<8x1xf32> -> vector<8x1xf32>
      %c0_13 = arith.constant 0 : index
      %c0_14 = arith.constant 0 : index
      %c0_15 = arith.constant 0 : index
      %22 = vector.load %arg12[%c0_13, %c0_14, %c0_15] : memref<4x8x8xf32, #tpu.memory_space<vmem>>, vector<1x8x8xf32>
      %23 = vector.shape_cast %22 : vector<1x8x8xf32> to vector<8x8xf32>
      %24 = vector.broadcast %21 : vector<8x1xf32> to vector<8x8xf32>
      %25 = arith.mulf %23, %24 : vector<8x8xf32>
      %26 = arith.truncf %25 : vector<8x8xf32> to vector<8x8xbf16>
      %c0_16 = arith.constant 0 : index
      %c0_17 = arith.constant 0 : index
      %c0_18 = arith.constant 0 : index
      %27 = vector.load %arg7[%c0_16, %c0_17, %c0_18] : memref<4x8x32xbf16, #tpu.memory_space<vmem>>, vector<1x8x32xbf16>
      %28 = vector.shape_cast %27 : vector<1x8x32xbf16> to vector<8x32xbf16>
      %cst = arith.constant dense<0.000000e+00> : vector<8x32xf32>
      %29 = tpu.matmul %26, %28, %cst {dimension_numbers = #tpu.dot_dimension_numbers<[1], [0], [0], [1], [0, 0, 1, 1], [], []>} : vector<8x8xbf16>, vector<8x32xbf16>, vector<8x32xf32> -> vector<8x32xf32>
      %30 = arith.addf %18, %29 : vector<8x32xf32>
      %c1 = arith.constant 1 : index
      %c0_19 = arith.constant 0 : index
      %c0_20 = arith.constant 0 : index
      %31 = vector.load %arg11[%c1, %c0_19, %c0_20] : memref<4x8x1xf32, #tpu.memory_space<vmem>>, vector<1x8x1xf32>
      %32 = vector.shape_cast %31 : vector<1x8x1xf32> to vector<8x1xf32>
      %33 = tpu.reciprocal %32 {approx = true} : vector<8x1xf32> -> vector<8x1xf32>
      %c1_21 = arith.constant 1 : index
      %c0_22 = arith.constant 0 : index
      %c0_23 = arith.constant 0 : index
      %34 = vector.load %arg12[%c1_21, %c0_22, %c0_23] : memref<4x8x8xf32, #tpu.memory_space<vmem>>, vector<1x8x8xf32>
      %35 = vector.shape_cast %34 : vector<1x8x8xf32> to vector<8x8xf32>
      %36 = vector.broadcast %33 : vector<8x1xf32> to vector<8x8xf32>
      %37 = arith.mulf %35, %36 : vector<8x8xf32>
      %38 = arith.truncf %37 : vector<8x8xf32> to vector<8x8xbf16>
      %c1_24 = arith.constant 1 : index
      %c0_25 = arith.constant 0 : index
      %c0_26 = arith.constant 0 : index
      %39 = vector.load %arg7[%c1_24, %c0_25, %c0_26] : memref<4x8x32xbf16, #tpu.memory_space<vmem>>, vector<1x8x32xbf16>
      %40 = vector.shape_cast %39 : vector<1x8x32xbf16> to vector<8x32xbf16>
      %cst_27 = arith.constant dense<0.000000e+00> : vector<8x32xf32>
      %41 = tpu.matmul %38, %40, %cst_27 {dimension_numbers = #tpu.dot_dimension_numbers<[1], [0], [0], [1], [0, 0, 1, 1], [], []>} : vector<8x8xbf16>, vector<8x32xbf16>, vector<8x32xf32> -> vector<8x32xf32>
      %42 = arith.addf %30, %41 : vector<8x32xf32>
      %c2 = arith.constant 2 : index
      %c0_28 = arith.constant 0 : index
      %c0_29 = arith.constant 0 : index
      %43 = vector.load %arg11[%c2, %c0_28, %c0_29] : memref<4x8x1xf32, #tpu.memory_space<vmem>>, vector<1x8x1xf32>
      %44 = vector.shape_cast %43 : vector<1x8x1xf32> to vector<8x1xf32>
      %45 = tpu.reciprocal %44 {approx = true} : vector<8x1xf32> -> vector<8x1xf32>
      %c2_30 = arith.constant 2 : index
      %c0_31 = arith.constant 0 : index
      %c0_32 = arith.constant 0 : index
      %46 = vector.load %arg12[%c2_30, %c0_31, %c0_32] : memref<4x8x8xf32, #tpu.memory_space<vmem>>, vector<1x8x8xf32>
      %47 = vector.shape_cast %46 : vector<1x8x8xf32> to vector<8x8xf32>
      %48 = vector.broadcast %45 : vector<8x1xf32> to vector<8x8xf32>
      %49 = arith.mulf %47, %48 : vector<8x8xf32>
      %50 = arith.truncf %49 : vector<8x8xf32> to vector<8x8xbf16>
      %c2_33 = arith.constant 2 : index
      %c0_34 = arith.constant 0 : index
      %c0_35 = arith.constant 0 : index
      %51 = vector.load %arg7[%c2_33, %c0_34, %c0_35] : memref<4x8x32xbf16, #tpu.memory_space<vmem>>, vector<1x8x32xbf16>
      %52 = vector.shape_cast %51 : vector<1x8x32xbf16> to vector<8x32xbf16>
      %cst_36 = arith.constant dense<0.000000e+00> : vector<8x32xf32>
      %53 = tpu.matmul %50, %52, %cst_36 {dimension_numbers = #tpu.dot_dimension_numbers<[1], [0], [0], [1], [0, 0, 1, 1], [], []>} : vector<8x8xbf16>, vector<8x32xbf16>, vector<8x32xf32> -> vector<8x32xf32>
      %54 = arith.addf %42, %53 : vector<8x32xf32>
      %c3 = arith.constant 3 : index
      %c0_37 = arith.constant 0 : index
      %c0_38 = arith.constant 0 : index
      %55 = vector.load %arg11[%c3, %c0_37, %c0_38] : memref<4x8x1xf32, #tpu.memory_space<vmem>>, vector<1x8x1xf32>
      %56 = vector.shape_cast %55 : vector<1x8x1xf32> to vector<8x1xf32>
      %57 = tpu.reciprocal %56 {approx = true} : vector<8x1xf32> -> vector<8x1xf32>
      %c3_39 = arith.constant 3 : index
      %c0_40 = arith.constant 0 : index
      %c0_41 = arith.constant 0 : index
      %58 = vector.load %arg12[%c3_39, %c0_40, %c0_41] : memref<4x8x8xf32, #tpu.memory_space<vmem>>, vector<1x8x8xf32>
      %59 = vector.shape_cast %58 : vector<1x8x8xf32> to vector<8x8xf32>
      %60 = vector.broadcast %57 : vector<8x1xf32> to vector<8x8xf32>
      %61 = arith.mulf %59, %60 : vector<8x8xf32>
      %62 = arith.truncf %61 : vector<8x8xf32> to vector<8x8xbf16>
      %c3_42 = arith.constant 3 : index
      %c0_43 = arith.constant 0 : index
      %c0_44 = arith.constant 0 : index
      %63 = vector.load %arg7[%c3_42, %c0_43, %c0_44] : memref<4x8x32xbf16, #tpu.memory_space<vmem>>, vector<1x8x32xbf16>
      %64 = vector.shape_cast %63 : vector<1x8x32xbf16> to vector<8x32xbf16>
      %cst_45 = arith.constant dense<0.000000e+00> : vector<8x32xf32>
      %65 = tpu.matmul %62, %64, %cst_45 {dimension_numbers = #tpu.dot_dimension_numbers<[1], [0], [0], [1], [0, 0, 1, 1], [], []>} : vector<8x8xbf16>, vector<8x32xbf16>, vector<8x32xf32> -> vector<8x32xf32>
      %66 = arith.addf %54, %65 : vector<8x32xf32>
      %67 = arith.truncf %66 : vector<8x32xf32> to vector<8x32xbf16>
      %c0_46 = arith.constant 0 : index
      %c0_47 = arith.constant 0 : index
      %c0_48 = arith.constant 0 : index
      %68 = vector.load %arg9[%c0_46, %c0_47, %c0_48] : memref<1x8x32xbf16, #tpu.memory_space<vmem>>, vector<1x8x32xbf16>
      %69 = vector.shape_cast %68 : vector<1x8x32xbf16> to vector<8x32xbf16>
      %70 = vector.shape_cast %67 : vector<8x32xbf16> to vector<1x8x32xbf16>
      tpu.vector_store %arg9[%c0_46, %c0_47, %c0_48], %70 {strides = array<i32>} : memref<1x8x32xbf16, #tpu.memory_space<vmem>>, vector<1x8x32xbf16>,
    } else {
    }
    return
  }
  func.func @transform_0(%arg0: i32, %arg1: i32, %arg2: i32) -> (i32, i32, i32) {
    %c0_i32 = arith.constant 0 : i32
    %c0_i32_0 = arith.constant 0 : i32
    return %arg0, %arg1, %c0_i32 : i32, i32, i32
  }
  func.func @transform_1(%arg0: i32, %arg1: i32, %arg2: i32) -> (i32, i32, i32) {
    %c0_i32 = arith.constant 0 : i32
    %c0_i32_0 = arith.constant 0 : i32
    return %arg0, %arg1, %c0_i32 : i32, i32, i32
  }
  func.func @transform_2(%arg0: i32, %arg1: i32, %arg2: i32) -> (i32, i32, i32) {
    %c0_i32 = arith.constant 0 : i32
    %c0_i32_0 = arith.constant 0 : i32
    return %arg0, %arg2, %c0_i32 : i32, i32, i32
  }
  func.func @transform_3(%arg0: i32, %arg1: i32, %arg2: i32) -> (i32, i32, i32) {
    %c0_i32 = arith.constant 0 : i32
    %c0_i32_0 = arith.constant 0 : i32
    return %arg0, %arg2, %c0_i32 : i32, i32, i32
  }
  func.func @transform_4(%arg0: i32, %arg1: i32, %arg2: i32) -> (i32, i32, i32) {
    %c0_i32 = arith.constant 0 : i32
    %c0_i32_0 = arith.constant 0 : i32
    %c0_i32_1 = arith.constant 0 : i32
    %c0_i32_2 = arith.constant 0 : i32
    return %c0_i32, %c0_i32_0, %c0_i32_1 : i32, i32, i32
  }
  func.func @transform_5(%arg0: i32, %arg1: i32, %arg2: i32) -> (i32, i32) {
    %c0_i32 = arith.constant 0 : i32
    %c0_i32_0 = arith.constant 0 : i32
    %c0_i32_1 = arith.constant 0 : i32
    return %c0_i32, %c0_i32_0 : i32, i32
  }
  func.func @transform_6(%arg0: i32, %arg1: i32, %arg2: i32) -> (i32, i32, i32) {
    %c0_i32 = arith.constant 0 : i32
    %c0_i32_0 = arith.constant 0 : i32
    return %arg0, %arg1, %c0_i32 : i32, i32, i32
  }
}

module attributes {stable_mosaic.version = 11 : i64} {
  func.func @_ln_qkv_kernel(%arg0: i32, %arg1: i32, %arg2: memref<1x8x32xbf16, #tpu.memory_space<vmem>>, %arg3: memref<1x32xf32, #tpu.memory_space<vmem>>, %arg4: memref<1x32xf32, #tpu.memory_space<vmem>>, %arg5: memref<32x96xbf16, #tpu.memory_space<vmem>>, %arg6: memref<1x96xf32, #tpu.memory_space<vmem>>, %arg7: memref<1x8x32xbf16, #tpu.memory_space<vmem>>, %arg8: memref<1x8x32xbf16, #tpu.memory_space<vmem>>, %arg9: memref<1x8x32xbf16, #tpu.memory_space<vmem>>, %arg10: memref<1x8x32xbf16, #tpu.memory_space<vmem>>) attributes {dimension_semantics = [#tpu.dimension_semantics<parallel>, #tpu.dimension_semantics<parallel>], iteration_bounds = array<i64: 2, 1>, scalar_prefetch = 0 : i64, scratch_operands = 0 : i64, tpu.core_type = #tpu.core_type<tc>, window_params = [{transform_indices = @transform_0, window_bounds = array<i64: 1, 8, 32>}, {pipeline_mode = #tpu.pipeline_mode<synchronous>, transform_indices = @transform_1, window_bounds = array<i64: 1, 32>}, {pipeline_mode = #tpu.pipeline_mode<synchronous>, transform_indices = @transform_2, window_bounds = array<i64: 1, 32>}, {pipeline_mode = #tpu.pipeline_mode<synchronous>, transform_indices = @transform_3, window_bounds = array<i64: 32, 96>}, {pipeline_mode = #tpu.pipeline_mode<synchronous>, transform_indices = @transform_4, window_bounds = array<i64: 1, 96>}, {transform_indices = @transform_5, window_bounds = array<i64: 1, 8, 32>}, {transform_indices = @transform_6, window_bounds = array<i64: 1, 8, 32>}, {transform_indices = @transform_7, window_bounds = array<i64: 1, 8, 32>}, {transform_indices = @transform_8, window_bounds = array<i64: 1, 8, 32>}]} {
    %c0 = arith.constant 0 : index
    %c0_0 = arith.constant 0 : index
    %c0_1 = arith.constant 0 : index
    %0 = vector.load %arg2[%c0, %c0_0, %c0_1] : memref<1x8x32xbf16, #tpu.memory_space<vmem>>, vector<1x8x32xbf16>
    %1 = vector.shape_cast %0 : vector<1x8x32xbf16> to vector<8x32xbf16>
    %2 = arith.extf %1 : vector<8x32xbf16> to vector<8x32xf32>
    %c0_2 = arith.constant 0 : index
    %c0_3 = arith.constant 0 : index
    %3 = vector.load %arg3[%c0_2, %c0_3] : memref<1x32xf32, #tpu.memory_space<vmem>>, vector<1x32xf32>
    %c0_4 = arith.constant 0 : index
    %c0_5 = arith.constant 0 : index
    %4 = vector.load %arg4[%c0_4, %c0_5] : memref<1x32xf32, #tpu.memory_space<vmem>>, vector<1x32xf32>
    %cst = arith.constant dense<0.000000e+00> : vector<8xf32>
    %5 = vector.multi_reduction <add>, %2, %cst [1] : vector<8x32xf32> to vector<8xf32>
    %6 = vector.shape_cast %5 : vector<8xf32> to vector<8x1xf32>
    %cst_6 = arith.constant 3.200000e+01 : f32
    %7 = vector.broadcast %cst_6 : f32 to vector<8x1xf32>
    %8 = arith.divf %6, %7 : vector<8x1xf32>
    %9 = vector.broadcast %8 : vector<8x1xf32> to vector<8x32xf32>
    %10 = arith.subf %2, %9 : vector<8x32xf32>
    %11 = arith.mulf %10, %10 : vector<8x32xf32>
    %cst_7 = arith.constant dense<0.000000e+00> : vector<8xf32>
    %12 = vector.multi_reduction <add>, %11, %cst_7 [1] : vector<8x32xf32> to vector<8xf32>
    %13 = vector.shape_cast %12 : vector<8xf32> to vector<8x1xf32>
    %cst_8 = arith.constant 3.200000e+01 : f32
    %14 = vector.broadcast %cst_8 : f32 to vector<8x1xf32>
    %15 = arith.divf %13, %14 : vector<8x1xf32>
    %16 = vector.broadcast %8 : vector<8x1xf32> to vector<8x32xf32>
    %17 = arith.subf %2, %16 : vector<8x32xf32>
    %cst_9 = arith.constant 9.99999974E-6 : f32
    %18 = vector.broadcast %cst_9 : f32 to vector<8x1xf32>
    %19 = arith.addf %15, %18 : vector<8x1xf32>
    %20 = math.rsqrt %19 : vector<8x1xf32>
    %21 = vector.broadcast %20 : vector<8x1xf32> to vector<8x32xf32>
    %22 = arith.mulf %17, %21 : vector<8x32xf32>
    %23 = vector.broadcast %3 : vector<1x32xf32> to vector<8x32xf32>
    %24 = arith.mulf %22, %23 : vector<8x32xf32>
    %25 = vector.broadcast %4 : vector<1x32xf32> to vector<8x32xf32>
    %26 = arith.addf %24, %25 : vector<8x32xf32>
    %27 = arith.truncf %26 : vector<8x32xf32> to vector<8x32xbf16>
    %c0_10 = arith.constant 0 : index
    %c0_11 = arith.constant 0 : index
    %c0_12 = arith.constant 0 : index
    %28 = vector.load %arg7[%c0_10, %c0_11, %c0_12] : memref<1x8x32xbf16, #tpu.memory_space<vmem>>, vector<1x8x32xbf16>
    %29 = vector.shape_cast %28 : vector<1x8x32xbf16> to vector<8x32xbf16>
    %30 = vector.shape_cast %27 : vector<8x32xbf16> to vector<1x8x32xbf16>
    tpu.vector_store %arg7[%c0_10, %c0_11, %c0_12], %30 {strides = array<i32>} : memref<1x8x32xbf16, #tpu.memory_space<vmem>>, vector<1x8x32xbf16>,
    %c0_13 = arith.constant 0 : index
    %c0_14 = arith.constant 0 : index
    %31 = vector.load %arg5[%c0_13, %c0_14] : memref<32x96xbf16, #tpu.memory_space<vmem>>, vector<32x32xbf16>
    %c0_15 = arith.constant 0 : index
    %c0_16 = arith.constant 0 : index
    %32 = vector.load %arg6[%c0_15, %c0_16] : memref<1x96xf32, #tpu.memory_space<vmem>>, vector<1x32xf32>
    %cst_17 = arith.constant dense<0.000000e+00> : vector<8x32xf32>
    %33 = tpu.matmul %27, %31, %cst_17 {dimension_numbers = #tpu.dot_dimension_numbers<[1], [0], [0], [1], [0, 0, 1, 1], [], []>} : vector<8x32xbf16>, vector<32x32xbf16>, vector<8x32xf32> -> vector<8x32xf32>
    %34 = vector.broadcast %32 : vector<1x32xf32> to vector<8x32xf32>
    %35 = arith.addf %33, %34 : vector<8x32xf32>
    %36 = arith.truncf %35 : vector<8x32xf32> to vector<8x32xbf16>
    %c0_18 = arith.constant 0 : index
    %c0_19 = arith.constant 0 : index
    %c0_20 = arith.constant 0 : index
    %37 = vector.load %arg8[%c0_18, %c0_19, %c0_20] : memref<1x8x32xbf16, #tpu.memory_space<vmem>>, vector<1x8x32xbf16>
    %38 = vector.shape_cast %37 : vector<1x8x32xbf16> to vector<8x32xbf16>
    %39 = vector.shape_cast %36 : vector<8x32xbf16> to vector<1x8x32xbf16>
    tpu.vector_store %arg8[%c0_18, %c0_19, %c0_20], %39 {strides = array<i32>} : memref<1x8x32xbf16, #tpu.memory_space<vmem>>, vector<1x8x32xbf16>,
    %c0_21 = arith.constant 0 : index
    %c32 = arith.constant 32 : index
    %40 = vector.load %arg5[%c0_21, %c32] : memref<32x96xbf16, #tpu.memory_space<vmem>>, vector<32x32xbf16>
    %c0_22 = arith.constant 0 : index
    %c32_23 = arith.constant 32 : index
    %41 = vector.load %arg6[%c0_22, %c32_23] : memref<1x96xf32, #tpu.memory_space<vmem>>, vector<1x32xf32>
    %cst_24 = arith.constant dense<0.000000e+00> : vector<8x32xf32>
    %42 = tpu.matmul %27, %40, %cst_24 {dimension_numbers = #tpu.dot_dimension_numbers<[1], [0], [0], [1], [0, 0, 1, 1], [], []>} : vector<8x32xbf16>, vector<32x32xbf16>, vector<8x32xf32> -> vector<8x32xf32>
    %43 = vector.broadcast %41 : vector<1x32xf32> to vector<8x32xf32>
    %44 = arith.addf %42, %43 : vector<8x32xf32>
    %45 = arith.truncf %44 : vector<8x32xf32> to vector<8x32xbf16>
    %c0_25 = arith.constant 0 : index
    %c0_26 = arith.constant 0 : index
    %c0_27 = arith.constant 0 : index
    %46 = vector.load %arg9[%c0_25, %c0_26, %c0_27] : memref<1x8x32xbf16, #tpu.memory_space<vmem>>, vector<1x8x32xbf16>
    %47 = vector.shape_cast %46 : vector<1x8x32xbf16> to vector<8x32xbf16>
    %48 = vector.shape_cast %45 : vector<8x32xbf16> to vector<1x8x32xbf16>
    tpu.vector_store %arg9[%c0_25, %c0_26, %c0_27], %48 {strides = array<i32>} : memref<1x8x32xbf16, #tpu.memory_space<vmem>>, vector<1x8x32xbf16>,
    %c0_28 = arith.constant 0 : index
    %c64 = arith.constant 64 : index
    %49 = vector.load %arg5[%c0_28, %c64] : memref<32x96xbf16, #tpu.memory_space<vmem>>, vector<32x32xbf16>
    %c0_29 = arith.constant 0 : index
    %c64_30 = arith.constant 64 : index
    %50 = vector.load %arg6[%c0_29, %c64_30] : memref<1x96xf32, #tpu.memory_space<vmem>>, vector<1x32xf32>
    %cst_31 = arith.constant dense<0.000000e+00> : vector<8x32xf32>
    %51 = tpu.matmul %27, %49, %cst_31 {dimension_numbers = #tpu.dot_dimension_numbers<[1], [0], [0], [1], [0, 0, 1, 1], [], []>} : vector<8x32xbf16>, vector<32x32xbf16>, vector<8x32xf32> -> vector<8x32xf32>
    %52 = vector.broadcast %50 : vector<1x32xf32> to vector<8x32xf32>
    %53 = arith.addf %51, %52 : vector<8x32xf32>
    %54 = arith.truncf %53 : vector<8x32xf32> to vector<8x32xbf16>
    %c0_32 = arith.constant 0 : index
    %c0_33 = arith.constant 0 : index
    %c0_34 = arith.constant 0 : index
    %55 = vector.load %arg10[%c0_32, %c0_33, %c0_34] : memref<1x8x32xbf16, #tpu.memory_space<vmem>>, vector<1x8x32xbf16>
    %56 = vector.shape_cast %55 : vector<1x8x32xbf16> to vector<8x32xbf16>
    %57 = vector.shape_cast %54 : vector<8x32xbf16> to vector<1x8x32xbf16>
    tpu.vector_store %arg10[%c0_32, %c0_33, %c0_34], %57 {strides = array<i32>} : memref<1x8x32xbf16, #tpu.memory_space<vmem>>, vector<1x8x32xbf16>,
    return
  }
  func.func @transform_0(%arg0: i32, %arg1: i32) -> (i32, i32, i32) {
    %c0_i32 = arith.constant 0 : i32
    %c0_i32_0 = arith.constant 0 : i32
    return %arg0, %arg1, %c0_i32 : i32, i32, i32
  }
  func.func @transform_1(%arg0: i32, %arg1: i32) -> (i32, i32) {
    %c0_i32 = arith.constant 0 : i32
    %c0_i32_0 = arith.constant 0 : i32
    %c0_i32_1 = arith.constant 0 : i32
    return %c0_i32, %c0_i32_0 : i32, i32
  }
  func.func @transform_2(%arg0: i32, %arg1: i32) -> (i32, i32) {
    %c0_i32 = arith.constant 0 : i32
    %c0_i32_0 = arith.constant 0 : i32
    %c0_i32_1 = arith.constant 0 : i32
    return %c0_i32, %c0_i32_0 : i32, i32
  }
  func.func @transform_3(%arg0: i32, %arg1: i32) -> (i32, i32) {
    %c0_i32 = arith.constant 0 : i32
    %c0_i32_0 = arith.constant 0 : i32
    %c0_i32_1 = arith.constant 0 : i32
    return %c0_i32, %c0_i32_0 : i32, i32
  }
  func.func @transform_4(%arg0: i32, %arg1: i32) -> (i32, i32) {
    %c0_i32 = arith.constant 0 : i32
    %c0_i32_0 = arith.constant 0 : i32
    %c0_i32_1 = arith.constant 0 : i32
    return %c0_i32, %c0_i32_0 : i32, i32
  }
  func.func @transform_5(%arg0: i32, %arg1: i32) -> (i32, i32, i32) {
    %c0_i32 = arith.constant 0 : i32
    %c0_i32_0 = arith.constant 0 : i32
    return %arg0, %arg1, %c0_i32 : i32, i32, i32
  }
  func.func @transform_6(%arg0: i32, %arg1: i32) -> (i32, i32, i32) {
    %c0_i32 = arith.constant 0 : i32
    %c0_i32_0 = arith.constant 0 : i32
    return %arg0, %arg1, %c0_i32 : i32, i32, i32
  }
  func.func @transform_7(%arg0: i32, %arg1: i32) -> (i32, i32, i32) {
    %c0_i32 = arith.constant 0 : i32
    %c0_i32_0 = arith.constant 0 : i32
    return %arg0, %arg1, %c0_i32 : i32, i32, i32
  }
  func.func @transform_8(%arg0: i32, %arg1: i32) -> (i32, i32, i32) {
    %c0_i32 = arith.constant 0 : i32
    %c0_i32_0 = arith.constant 0 : i32
    return %arg0, %arg1, %c0_i32 : i32, i32, i32
  }
}

module attributes {stable_mosaic.version = 11 : i64} {
  func.func @_lnf_kernel(%arg0: i32, %arg1: i32, %arg2: memref<1x8x32xbf16, #tpu.memory_space<vmem>>, %arg3: memref<1x32xf32, #tpu.memory_space<vmem>>, %arg4: memref<1x32xf32, #tpu.memory_space<vmem>>, %arg5: memref<1x8x32xbf16, #tpu.memory_space<vmem>>) attributes {dimension_semantics = [#tpu.dimension_semantics<parallel>, #tpu.dimension_semantics<parallel>], iteration_bounds = array<i64: 2, 1>, scalar_prefetch = 0 : i64, scratch_operands = 0 : i64, tpu.core_type = #tpu.core_type<tc>, window_params = [{transform_indices = @transform_0, window_bounds = array<i64: 1, 8, 32>}, {pipeline_mode = #tpu.pipeline_mode<synchronous>, transform_indices = @transform_1, window_bounds = array<i64: 1, 32>}, {pipeline_mode = #tpu.pipeline_mode<synchronous>, transform_indices = @transform_2, window_bounds = array<i64: 1, 32>}, {transform_indices = @transform_3, window_bounds = array<i64: 1, 8, 32>}]} {
    %c0 = arith.constant 0 : index
    %c0_0 = arith.constant 0 : index
    %c0_1 = arith.constant 0 : index
    %0 = vector.load %arg2[%c0, %c0_0, %c0_1] : memref<1x8x32xbf16, #tpu.memory_space<vmem>>, vector<1x8x32xbf16>
    %1 = vector.shape_cast %0 : vector<1x8x32xbf16> to vector<8x32xbf16>
    %2 = arith.extf %1 : vector<8x32xbf16> to vector<8x32xf32>
    %c0_2 = arith.constant 0 : index
    %c0_3 = arith.constant 0 : index
    %3 = vector.load %arg3[%c0_2, %c0_3] : memref<1x32xf32, #tpu.memory_space<vmem>>, vector<1x32xf32>
    %c0_4 = arith.constant 0 : index
    %c0_5 = arith.constant 0 : index
    %4 = vector.load %arg4[%c0_4, %c0_5] : memref<1x32xf32, #tpu.memory_space<vmem>>, vector<1x32xf32>
    %cst = arith.constant dense<0.000000e+00> : vector<8xf32>
    %5 = vector.multi_reduction <add>, %2, %cst [1] : vector<8x32xf32> to vector<8xf32>
    %6 = vector.shape_cast %5 : vector<8xf32> to vector<8x1xf32>
    %cst_6 = arith.constant 3.200000e+01 : f32
    %7 = vector.broadcast %cst_6 : f32 to vector<8x1xf32>
    %8 = arith.divf %6, %7 : vector<8x1xf32>
    %9 = vector.broadcast %8 : vector<8x1xf32> to vector<8x32xf32>
    %10 = arith.subf %2, %9 : vector<8x32xf32>
    %11 = arith.mulf %10, %10 : vector<8x32xf32>
    %cst_7 = arith.constant dense<0.000000e+00> : vector<8xf32>
    %12 = vector.multi_reduction <add>, %11, %cst_7 [1] : vector<8x32xf32> to vector<8xf32>
    %13 = vector.shape_cast %12 : vector<8xf32> to vector<8x1xf32>
    %cst_8 = arith.constant 3.200000e+01 : f32
    %14 = vector.broadcast %cst_8 : f32 to vector<8x1xf32>
    %15 = arith.divf %13, %14 : vector<8x1xf32>
    %16 = vector.broadcast %8 : vector<8x1xf32> to vector<8x32xf32>
    %17 = arith.subf %2, %16 : vector<8x32xf32>
    %cst_9 = arith.constant 9.99999974E-6 : f32
    %18 = vector.broadcast %cst_9 : f32 to vector<8x1xf32>
    %19 = arith.addf %15, %18 : vector<8x1xf32>
    %20 = math.rsqrt %19 : vector<8x1xf32>
    %21 = vector.broadcast %20 : vector<8x1xf32> to vector<8x32xf32>
    %22 = arith.mulf %17, %21 : vector<8x32xf32>
    %23 = vector.broadcast %3 : vector<1x32xf32> to vector<8x32xf32>
    %24 = arith.mulf %22, %23 : vector<8x32xf32>
    %25 = vector.broadcast %4 : vector<1x32xf32> to vector<8x32xf32>
    %26 = arith.addf %24, %25 : vector<8x32xf32>
    %27 = arith.truncf %26 : vector<8x32xf32> to vector<8x32xbf16>
    %c0_10 = arith.constant 0 : index
    %c0_11 = arith.constant 0 : index
    %c0_12 = arith.constant 0 : index
    %28 = vector.load %arg5[%c0_10, %c0_11, %c0_12] : memref<1x8x32xbf16, #tpu.memory_space<vmem>>, vector<1x8x32xbf16>
    %29 = vector.shape_cast %28 : vector<1x8x32xbf16> to vector<8x32xbf16>
    %30 = vector.shape_cast %27 : vector<8x32xbf16> to vector<1x8x32xbf16>
    tpu.vector_store %arg5[%c0_10, %c0_11, %c0_12], %30 {strides = array<i32>} : memref<1x8x32xbf16, #tpu.memory_space<vmem>>, vector<1x8x32xbf16>,
    return
  }
  func.func @transform_0(%arg0: i32, %arg1: i32) -> (i32, i32, i32) {
    %c0_i32 = arith.constant 0 : i32
    %c0_i32_0 = arith.constant 0 : i32
    return %arg0, %arg1, %c0_i32 : i32, i32, i32
  }
  func.func @transform_1(%arg0: i32, %arg1: i32) -> (i32, i32) {
    %c0_i32 = arith.constant 0 : i32
    %c0_i32_0 = arith.constant 0 : i32
    %c0_i32_1 = arith.constant 0 : i32
    return %c0_i32, %c0_i32_0 : i32, i32
  }
  func.func @transform_2(%arg0: i32, %arg1: i32) -> (i32, i32) {
    %c0_i32 = arith.constant 0 : i32
    %c0_i32_0 = arith.constant 0 : i32
    %c0_i32_1 = arith.constant 0 : i32
    return %c0_i32, %c0_i32_0 : i32, i32
  }
  func.func @transform_3(%arg0: i32, %arg1: i32) -> (i32, i32, i32) {
    %c0_i32 = arith.constant 0 : i32
    %c0_i32_0 = arith.constant 0 : i32
    return %arg0, %arg1, %c0_i32 : i32, i32, i32
  }
}

module attributes {stable_mosaic.version = 11 : i64} {
  func.func @_mlp_kernel(%arg0: i32, %arg1: i32, %arg2: i32, %arg3: memref<1x8x32xbf16, #tpu.memory_space<vmem>>, %arg4: memref<1x32xf32, #tpu.memory_space<vmem>>, %arg5: memref<1x32xf32, #tpu.memory_space<vmem>>, %arg6: memref<32x128xbf16, #tpu.memory_space<vmem>>, %arg7: memref<1x128xf32, #tpu.memory_space<vmem>>, %arg8: memref<128x32xbf16, #tpu.memory_space<vmem>>, %arg9: memref<1x32xf32, #tpu.memory_space<vmem>>, %arg10: memref<1x8x32xbf16, #tpu.memory_space<vmem>>, %arg11: memref<8x32xf32, #tpu.memory_space<vmem>>, %arg12: memref<8x32xf32, #tpu.memory_space<vmem>>) attributes {dimension_semantics = [#tpu.dimension_semantics<parallel>, #tpu.dimension_semantics<parallel>, #tpu.dimension_semantics<arbitrary>], iteration_bounds = array<i64: 2, 1, 1>, scalar_prefetch = 0 : i64, scratch_operands = 2 : i64, tpu.core_type = #tpu.core_type<tc>, window_params = [{transform_indices = @transform_0, window_bounds = array<i64: 1, 8, 32>}, {pipeline_mode = #tpu.pipeline_mode<synchronous>, transform_indices = @transform_1, window_bounds = array<i64: 1, 32>}, {pipeline_mode = #tpu.pipeline_mode<synchronous>, transform_indices = @transform_2, window_bounds = array<i64: 1, 32>}, {transform_indices = @transform_3, window_bounds = array<i64: 32, 128>}, {transform_indices = @transform_4, window_bounds = array<i64: 1, 128>}, {transform_indices = @transform_5, window_bounds = array<i64: 128, 32>}, {pipeline_mode = #tpu.pipeline_mode<synchronous>, transform_indices = @transform_6, window_bounds = array<i64: 1, 32>}, {transform_indices = @transform_7, window_bounds = array<i64: 1, 8, 32>}]} {
    %c0_i32 = arith.constant 0 : i32
    %0 = arith.cmpi eq, %arg2, %c0_i32 : i32
    %1 = arith.extui %0 : i1 to i32
    %c0_i32_0 = arith.constant 0 : i32
    %2 = arith.cmpi ne, %1, %c0_i32_0 : i32
    scf.if %2 {
      %c0_19 = arith.constant 0 : index
      %c0_20 = arith.constant 0 : index
      %c0_21 = arith.constant 0 : index
      %32 = vector.load %arg3[%c0_19, %c0_20, %c0_21] : memref<1x8x32xbf16, #tpu.memory_space<vmem>>, vector<1x8x32xbf16>
      %33 = vector.shape_cast %32 : vector<1x8x32xbf16> to vector<8x32xbf16>
      %34 = arith.extf %33 : vector<8x32xbf16> to vector<8x32xf32>
      %c0_22 = arith.constant 0 : index
      %c0_23 = arith.constant 0 : index
      %35 = vector.load %arg4[%c0_22, %c0_23] : memref<1x32xf32, #tpu.memory_space<vmem>>, vector<1x32xf32>
      %c0_24 = arith.constant 0 : index
      %c0_25 = arith.constant 0 : index
      %36 = vector.load %arg5[%c0_24, %c0_25] : memref<1x32xf32, #tpu.memory_space<vmem>>, vector<1x32xf32>
      %cst_26 = arith.constant dense<0.000000e+00> : vector<8xf32>
      %37 = vector.multi_reduction <add>, %34, %cst_26 [1] : vector<8x32xf32> to vector<8xf32>
      %38 = vector.shape_cast %37 : vector<8xf32> to vector<8x1xf32>
      %cst_27 = arith.constant 3.200000e+01 : f32
      %39 = vector.broadcast %cst_27 : f32 to vector<8x1xf32>
      %40 = arith.divf %38, %39 : vector<8x1xf32>
      %41 = vector.broadcast %40 : vector<8x1xf32> to vector<8x32xf32>
      %42 = arith.subf %34, %41 : vector<8x32xf32>
      %43 = arith.mulf %42, %42 : vector<8x32xf32>
      %cst_28 = arith.constant dense<0.000000e+00> : vector<8xf32>
      %44 = vector.multi_reduction <add>, %43, %cst_28 [1] : vector<8x32xf32> to vector<8xf32>
      %45 = vector.shape_cast %44 : vector<8xf32> to vector<8x1xf32>
      %cst_29 = arith.constant 3.200000e+01 : f32
      %46 = vector.broadcast %cst_29 : f32 to vector<8x1xf32>
      %47 = arith.divf %45, %46 : vector<8x1xf32>
      %48 = vector.broadcast %40 : vector<8x1xf32> to vector<8x32xf32>
      %49 = arith.subf %34, %48 : vector<8x32xf32>
      %cst_30 = arith.constant 9.99999974E-6 : f32
      %50 = vector.broadcast %cst_30 : f32 to vector<8x1xf32>
      %51 = arith.addf %47, %50 : vector<8x1xf32>
      %52 = math.rsqrt %51 : vector<8x1xf32>
      %53 = vector.broadcast %52 : vector<8x1xf32> to vector<8x32xf32>
      %54 = arith.mulf %49, %53 : vector<8x32xf32>
      %55 = vector.broadcast %35 : vector<1x32xf32> to vector<8x32xf32>
      %56 = arith.mulf %54, %55 : vector<8x32xf32>
      %57 = vector.broadcast %36 : vector<1x32xf32> to vector<8x32xf32>
      %58 = arith.addf %56, %57 : vector<8x32xf32>
      %c0_31 = arith.constant 0 : index
      %c0_32 = arith.constant 0 : index
      %59 = vector.load %arg11[%c0_31, %c0_32] : memref<8x32xf32, #tpu.memory_space<vmem>>, vector<8x32xf32>
      tpu.vector_store %arg11[%c0_31, %c0_32], %58 {strides = array<i32>} : memref<8x32xf32, #tpu.memory_space<vmem>>, vector<8x32xf32>,
      %cst_33 = arith.constant 0.000000e+00 : f32
      %60 = vector.broadcast %cst_33 : f32 to vector<8x32xf32>
      %c0_34 = arith.constant 0 : index
      %c0_35 = arith.constant 0 : index
      %61 = vector.load %arg12[%c0_34, %c0_35] : memref<8x32xf32, #tpu.memory_space<vmem>>, vector<8x32xf32>
      tpu.vector_store %arg12[%c0_34, %c0_35], %60 {strides = array<i32>} : memref<8x32xf32, #tpu.memory_space<vmem>>, vector<8x32xf32>,
    } else {
    }
    %c0 = arith.constant 0 : index
    %c0_1 = arith.constant 0 : index
    %3 = vector.load %arg11[%c0, %c0_1] : memref<8x32xf32, #tpu.memory_space<vmem>>, vector<8x32xf32>
    %4 = arith.truncf %3 : vector<8x32xf32> to vector<8x32xbf16>
    %c0_2 = arith.constant 0 : index
    %c0_3 = arith.constant 0 : index
    %5 = vector.load %arg6[%c0_2, %c0_3] : memref<32x128xbf16, #tpu.memory_space<vmem>>, vector<32x128xbf16>
    %cst = arith.constant dense<0.000000e+00> : vector<8x128xf32>
    %6 = tpu.matmul %4, %5, %cst {dimension_numbers = #tpu.dot_dimension_numbers<[1], [0], [0], [1], [0, 0, 1, 1], [], []>} : vector<8x32xbf16>, vector<32x128xbf16>, vector<8x128xf32> -> vector<8x128xf32>
    %c0_4 = arith.constant 0 : index
    %c0_5 = arith.constant 0 : index
    %7 = vector.load %arg7[%c0_4, %c0_5] : memref<1x128xf32, #tpu.memory_space<vmem>>, vector<1x128xf32>
    %8 = vector.broadcast %7 : vector<1x128xf32> to vector<8x128xf32>
    %9 = arith.addf %6, %8 : vector<8x128xf32>
    %cst_6 = arith.constant 5.000000e-01 : f32
    %10 = vector.broadcast %cst_6 : f32 to vector<8x128xf32>
    %11 = arith.mulf %10, %9 : vector<8x128xf32>
    %cst_7 = arith.constant 4.471500e-02 : f32
    %12 = vector.broadcast %cst_7 : f32 to vector<8x128xf32>
    %13 = arith.mulf %12, %9 : vector<8x128xf32>
    %14 = arith.mulf %13, %9 : vector<8x128xf32>
    %15 = arith.mulf %14, %9 : vector<8x128xf32>
    %16 = arith.addf %9, %15 : vector<8x128xf32>
    %cst_8 = arith.constant 0.797884583 : f32
    %17 = vector.broadcast %cst_8 : f32 to vector<8x128xf32>
    %18 = arith.mulf %17, %16 : vector<8x128xf32>
    %19 = math.tanh %18 : vector<8x128xf32>
    %cst_9 = arith.constant 1.000000e+00 : f32
    %20 = vector.broadcast %cst_9 : f32 to vector<8x128xf32>
    %21 = arith.addf %20, %19 : vector<8x128xf32>
    %22 = arith.mulf %11, %21 : vector<8x128xf32>
    %c0_10 = arith.constant 0 : index
    %c0_11 = arith.constant 0 : index
    %23 = vector.load %arg12[%c0_10, %c0_11] : memref<8x32xf32, #tpu.memory_space<vmem>>, vector<8x32xf32>
    %24 = arith.truncf %22 : vector<8x128xf32> to vector<8x128xbf16>
    %c0_12 = arith.constant 0 : index
    %c0_13 = arith.constant 0 : index
    %25 = vector.load %arg8[%c0_12, %c0_13] : memref<128x32xbf16, #tpu.memory_space<vmem>>, vector<128x32xbf16>
    %cst_14 = arith.constant dense<0.000000e+00> : vector<8x32xf32>
    %26 = tpu.matmul %24, %25, %cst_14 {dimension_numbers = #tpu.dot_dimension_numbers<[1], [0], [0], [1], [0, 0, 1, 1], [], []>} : vector<8x128xbf16>, vector<128x32xbf16>, vector<8x32xf32> -> vector<8x32xf32>
    %27 = arith.addf %23, %26 : vector<8x32xf32>
    %c0_15 = arith.constant 0 : index
    %c0_16 = arith.constant 0 : index
    %28 = vector.load %arg12[%c0_15, %c0_16] : memref<8x32xf32, #tpu.memory_space<vmem>>, vector<8x32xf32>
    tpu.vector_store %arg12[%c0_15, %c0_16], %27 {strides = array<i32>} : memref<8x32xf32, #tpu.memory_space<vmem>>, vector<8x32xf32>,
    %c0_i32_17 = arith.constant 0 : i32
    %29 = arith.cmpi eq, %arg2, %c0_i32_17 : i32
    %30 = arith.extui %29 : i1 to i32
    %c0_i32_18 = arith.constant 0 : i32
    %31 = arith.cmpi ne, %30, %c0_i32_18 : i32
    scf.if %31 {
      %c0_19 = arith.constant 0 : index
      %c0_20 = arith.constant 0 : index
      %32 = vector.load %arg11[%c0_19, %c0_20] : memref<8x32xf32, #tpu.memory_space<vmem>>, vector<8x32xf32>
      %c0_21 = arith.constant 0 : index
      %c0_22 = arith.constant 0 : index
      %33 = vector.load %arg12[%c0_21, %c0_22] : memref<8x32xf32, #tpu.memory_space<vmem>>, vector<8x32xf32>
      %34 = arith.addf %32, %33 : vector<8x32xf32>
      %c0_23 = arith.constant 0 : index
      %c0_24 = arith.constant 0 : index
      %35 = vector.load %arg9[%c0_23, %c0_24] : memref<1x32xf32, #tpu.memory_space<vmem>>, vector<1x32xf32>
      %36 = vector.broadcast %35 : vector<1x32xf32> to vector<8x32xf32>
      %37 = arith.addf %34, %36 : vector<8x32xf32>
      %38 = arith.truncf %37 : vector<8x32xf32> to vector<8x32xbf16>
      %c0_25 = arith.constant 0 : index
      %c0_26 = arith.constant 0 : index
      %c0_27 = arith.constant 0 : index
      %39 = vector.load %arg10[%c0_25, %c0_26, %c0_27] : memref<1x8x32xbf16, #tpu.memory_space<vmem>>, vector<1x8x32xbf16>
      %40 = vector.shape_cast %39 : vector<1x8x32xbf16> to vector<8x32xbf16>
      %41 = vector.shape_cast %38 : vector<8x32xbf16> to vector<1x8x32xbf16>
      tpu.vector_store %arg10[%c0_25, %c0_26, %c0_27], %41 {strides = array<i32>} : memref<1x8x32xbf16, #tpu.memory_space<vmem>>, vector<1x8x32xbf16>,
    } else {
    }
    return
  }
  func.func @transform_0(%arg0: i32, %arg1: i32, %arg2: i32) -> (i32, i32, i32) {
    %c0_i32 = arith.constant 0 : i32
    %c0_i32_0 = arith.constant 0 : i32
    return %arg0, %arg1, %c0_i32 : i32, i32, i32
  }
  func.func @transform_1(%arg0: i32, %arg1: i32, %arg2: i32) -> (i32, i32) {
    %c0_i32 = arith.constant 0 : i32
    %c0_i32_0 = arith.constant 0 : i32
    %c0_i32_1 = arith.constant 0 : i32
    return %c0_i32, %c0_i32_0 : i32, i32
  }
  func.func @transform_2(%arg0: i32, %arg1: i32, %arg2: i32) -> (i32, i32) {
    %c0_i32 = arith.constant 0 : i32
    %c0_i32_0 = arith.constant 0 : i32
    %c0_i32_1 = arith.constant 0 : i32
    return %c0_i32, %c0_i32_0 : i32, i32
  }
  func.func @transform_3(%arg0: i32, %arg1: i32, %arg2: i32) -> (i32, i32) {
    %c0_i32 = arith.constant 0 : i32
    %c0_i32_0 = arith.constant 0 : i32
    return %c0_i32, %arg2 : i32, i32
  }
  func.func @transform_4(%arg0: i32, %arg1: i32, %arg2: i32) -> (i32, i32) {
    %c0_i32 = arith.constant 0 : i32
    %c0_i32_0 = arith.constant 0 : i32
    return %c0_i32, %arg2 : i32, i32
  }
  func.func @transform_5(%arg0: i32, %arg1: i32, %arg2: i32) -> (i32, i32) {
    %c0_i32 = arith.constant 0 : i32
    %c0_i32_0 = arith.constant 0 : i32
    return %arg2, %c0_i32 : i32, i32
  }
  func.func @transform_6(%arg0: i32, %arg1: i32, %arg2: i32) -> (i32, i32) {
    %c0_i32 = arith.constant 0 : i32
    %c0_i32_0 = arith.constant 0 : i32
    %c0_i32_1 = arith.constant 0 : i32
    return %c0_i32, %c0_i32_0 : i32, i32
  }
  func.func @transform_7(%arg0: i32, %arg1: i32, %arg2: i32) -> (i32, i32, i32) {
    %c0_i32 = arith.constant 0 : i32
    %c0_i32_0 = arith.constant 0 : i32
    return %arg0, %arg1, %c0_i32 : i32, i32, i32
  }
}

module attributes {stable_mosaic.version = 11 : i64} {
  func.func @_lm_head_kernel(%arg0: i32, %arg1: i32, %arg2: i32, %arg3: memref<1x8x32xbf16, #tpu.memory_space<vmem>>, %arg4: memref<32x64xbf16, #tpu.memory_space<vmem>>, %arg5: memref<1x8x64xf32, #tpu.memory_space<vmem>>) attributes {dimension_semantics = [#tpu.dimension_semantics<parallel>, #tpu.dimension_semantics<parallel>, #tpu.dimension_semantics<parallel>], iteration_bounds = array<i64: 2, 1, 1>, scalar_prefetch = 0 : i64, scratch_operands = 0 : i64, tpu.core_type = #tpu.core_type<tc>, window_params = [{transform_indices = @transform_0, window_bounds = array<i64: 1, 8, 32>}, {transform_indices = @transform_1, window_bounds = array<i64: 32, 64>}, {transform_indices = @transform_2, window_bounds = array<i64: 1, 8, 64>}]} {
    %c0 = arith.constant 0 : index
    %c0_0 = arith.constant 0 : index
    %c0_1 = arith.constant 0 : index
    %0 = vector.load %arg3[%c0, %c0_0, %c0_1] : memref<1x8x32xbf16, #tpu.memory_space<vmem>>, vector<1x8x32xbf16>
    %1 = vector.shape_cast %0 : vector<1x8x32xbf16> to vector<8x32xbf16>
    %c0_2 = arith.constant 0 : index
    %c0_3 = arith.constant 0 : index
    %2 = vector.load %arg4[%c0_2, %c0_3] : memref<32x64xbf16, #tpu.memory_space<vmem>>, vector<32x64xbf16>
    %cst = arith.constant dense<0.000000e+00> : vector<8x64xf32>
    %3 = tpu.matmul %1, %2, %cst {dimension_numbers = #tpu.dot_dimension_numbers<[1], [0], [0], [1], [0, 0, 1, 1], [], []>} : vector<8x32xbf16>, vector<32x64xbf16>, vector<8x64xf32> -> vector<8x64xf32>
    %c0_4 = arith.constant 0 : index
    %c0_5 = arith.constant 0 : index
    %c0_6 = arith.constant 0 : index
    %4 = vector.load %arg5[%c0_4, %c0_5, %c0_6] : memref<1x8x64xf32, #tpu.memory_space<vmem>>, vector<1x8x64xf32>
    %5 = vector.shape_cast %4 : vector<1x8x64xf32> to vector<8x64xf32>
    %6 = vector.shape_cast %3 : vector<8x64xf32> to vector<1x8x64xf32>
    tpu.vector_store %arg5[%c0_4, %c0_5, %c0_6], %6 {strides = array<i32>} : memref<1x8x64xf32, #tpu.memory_space<vmem>>, vector<1x8x64xf32>,
    return
  }
  func.func @transform_0(%arg0: i32, %arg1: i32, %arg2: i32) -> (i32, i32, i32) {
    %c0_i32 = arith.constant 0 : i32
    %c0_i32_0 = arith.constant 0 : i32
    return %arg0, %arg1, %c0_i32 : i32, i32, i32
  }
  func.func @transform_1(%arg0: i32, %arg1: i32, %arg2: i32) -> (i32, i32) {
    %c0_i32 = arith.constant 0 : i32
    %c0_i32_0 = arith.constant 0 : i32
    return %c0_i32, %arg2 : i32, i32
  }
  func.func @transform_2(%arg0: i32, %arg1: i32, %arg2: i32) -> (i32, i32, i32) {
    %c0_i32 = arith.constant 0 : i32
    return %arg0, %arg1, %arg2 : i32, i32, i32
  }
}

</mosaic_0001>

<bundles_post_ra>
// kernel: gpt_forward.14
= control target key start
LH: loop header
LB: loop body
LE: loop exit
PB: predicated region body
PF: predicated region fallthrough
CT: control target
= control target key end

     0   :  { %s401_s12 = smov 0   ;;  %s403_s13 = smov 0   ;;  %s449_s0 = inlined_call_operand.vmem [shape: bf16[2,8,32], index: 0, kind: input, shape index: {}]   ;;  %s450_s1 = inlined_call_operand.vmem [shape: f32[1,32], index: 1, kind: input, shape index: {}]   ;;  %s451_s2 = inlined_call_operand.vmem [shape: f32[1,32], index: 2, kind: input, shape index: {}]   ;;  %s452_s3 = inlined_call_operand.vmem [shape: bf16[2,8,32], index: 3, kind: output, shape index: {}]  }
   0x1   :  { %s405_s14 = smov 0  }
   0x2 LB: > { %s25_s15 = sadd.s32 1, %s374_s13  ;;  %p320_p0 = scmp.ge.s32.totalorder %s378_s14, 1  ;;  %s378_s14 = sphi %s405_s14, %s13_s14   ;;  %s374_s13 = sphi %s403_s13, %s454_s13   ;;  %s370_s12 = sphi %s401_s12, %s453_s12  }
   0x3   : > { %p27_p1 = scmp.ge.s32.totalorder %s25_s15, 2  ;;  %p155_p2 = scmp.lt.s32.totalorder %s378_s14, 3 }
   0x5   : > { %s456_s15 = smov (%p27_p1, %s25_s15), 0  ;;  %p156_p3 = pnand %p320_p0, %p155_p2 }
   0x6   : > { %p183_p4 = scmp.lt.s32.totalorder (!%p156_p3), %s370_s12, 1 }
   0x7   : > { %159 = sbr.rel (%p156_p3) target bundleno = 289 (0x121), region = 32 }
   0xc   : > { %s458_s12 = smov (!%p183_p4, %s370_s12), 1  ;;  %vm201_vm0 = vcmask 261120   ;;  %v380_v3 = vmov 32.0   ;;  %v350_v24 = vld [vmem:[%s450_s1] ss:$0 sm:$0xff]  ;;  %vm240_vm5 = vcmask 257024  }
   0xd   : > { %s321_s16 = sshll.u32 %s458_s12, 2  ;;  %352 = vrcp.f32 %v380_v3  ;;  %v351_v26 = vld [vmem:[%s451_s2] ss:$0 sm:$0xff] }
   0xe   : > { %s189_s19 = scalar_lea.vmem %s449_s0, %s321_s16  ;;  %s196_s26 = scalar_lea.vmem %s452_s3, %s321_s16 }
   0xf   : > { %v197_v0 = vld [vmem:[%s189_s19] sm:$0xf] }
  0x10   : > { %v198_v1 = vunpack.c.l.bf16 %v197_v0 }
  0x12   : > { %v202_v2 = vsel %vm201_vm0, %v198_v1, 0.0 }
  0x13   : > { %203 = vadd.xlane.f32.xlu0 %v202_v2  ;;  %v353_v4 = vpop.eup %352 }
  0x14   : > { %v206_v5 = vmul.f32 32.0, %v353_v4  ;;  %vm210_vm1 = vweird.f32 %v353_v4 }
  0x16   : > { %v207_v6 = vsub.f32 1.0, %v206_v5 }
  0x18   : > { %v208_v7 = vmul.f32 %v353_v4, %v207_v6 }
  0x1a   : > { %v209_v8 = vadd.f32 %v353_v4, %v208_v7 }
  0x1c   : > { %v211_v9 = vsel %vm210_vm1, %v353_v4, %v209_v8 }
  0x86   : > { %v204_v10 = vpop.xlane.xlu0 %203 }
  0x87   : > { %v212_v11 = vmul.f32 %v211_v9, %v204_v10 }
  0x89   : > { %v213_v12 = vsub.f32 %v198_v1, %v212_v11 }
  0x8b   : > { %v214_v13 = vmul.f32 %v213_v12, %v213_v12 }
  0x8d   : > { %v215_v14 = vsel %vm201_vm0, %v214_v13, 0.0 }
  0x8e   : > { %216 = vadd.xlane.f32.xlu0 %v215_v14 }
 0x101   : > { %v217_v15 = vpop.xlane.xlu0 %216 }
 0x102   : > { %v218_v16 = vmul.f32 %v217_v15, %v211_v9 }
 0x104   : > { %v219_v17 = vadd.f32 1e-05, %v218_v16 }
 0x106   : > { %354 = vrsqrt.f32 %v219_v17  ;;  %vm226_vm3 = vweird.f32 %v219_v17 }
 0x10c   : > { %v355_v18 = vpop.eup %354 }
 0x10d   : > { %v221_v19 = vmul.f32 %v355_v18, %v219_v17  ;;  %vm227_vm2 = vweird.f32 %v355_v18 }
 0x10e   : > { %vm228_vm4 = vmor %vm226_vm3, %vm227_vm2 }
 0x10f   : > { %v222_v20 = vmul.f32 %v355_v18, %v221_v19 }
 0x111   : > { %v223_v21 = vmul.f32 0.5, %v222_v20 }
 0x113   : > { %v224_v22 = vsub.f32 1.5, %v223_v21 }
 0x115   : > { %v225_v23 = vmul.f32 %v355_v18, %v224_v22 }
 0x117   : > { %v229_v25 = vsel %vm228_vm4, %v355_v18, %v225_v23 }
 0x118   : > { %v230_v27 = vmul.f32 %v229_v25, %v213_v12 }
 0x11a   : > { %v234_v28 = vmul.f32 %v350_v24, %v230_v27 }
 0x11c   : > { %v238_v29 = vadd.f32 %v351_v26, %v234_v28 }
 0x11e   : > { %v239_v30 = vpack.c.bf16 %v238_v29, %v238_v29 }
 0x120   : > { %241 = vst.msk [vmem:[%s196_s26] sm:$0xf] %vm240_vm5, %v239_v30 }
 0x121 PF: > { %s13_s14 = sadd.s32 1, %s378_s14   ;;  %s453_s12 = smov %s374_s13 }
 0x122   : > { %p10_p5 = scmp.ge.s32.totalorder %s13_s14, 4   ;;  %s454_s13 = smov %s456_s15 }
 0x124   :  { %12 = sbr.rel (!%p10_p5) target bundleno = 2 (0x2), region = 62 }

// kernel: gpt_forward.8
= control target key start
LH: loop header
LB: loop body
LE: loop exit
PB: predicated region body
PF: predicated region fallthrough
CT: control target
= control target key end

     0   :  { %s903_s27 = smov 0   ;;  %s905_s28 = smov 0   ;;  %s1000_s0 = inlined_call_operand.vmem [shape: bf16[2,8,32], index: 0, kind: input, shape index: {}]   ;;  %s1001_s1 = inlined_call_operand.vmem [shape: f32[1,32], index: 1, kind: input, shape index: {}]   ;;  %s1002_s2 = inlined_call_operand.vmem [shape: f32[1,32], index: 2, kind: input, shape index: {}]   ;;  %s1003_s3 = inlined_call_operand.vmem [shape: bf16[32,96], index: 3, kind: input, shape index: {}]   ;;  %s1004_s4 = inlined_call_operand.vmem [shape: f32[1,96], index: 4, kind: input, shape index: {}]   ;;  %s1005_s5 = inlined_call_operand.vmem [shape: bf16[2,8,32], index: 5, kind: output, shape index: {0}]   ;;  %s1006_s6 = inlined_call_operand.vmem [shape: bf16[2,8,32], index: 6, kind: output, shape index: {1}]   ;;  %s1007_s7 = inlined_call_operand.vmem [shape: bf16[2,8,32], index: 7, kind: output, shape index: {2}]   ;;  %s1008_s8 = inlined_call_operand.vmem [shape: bf16[2,8,32], index: 8, kind: output, shape index: {3}]  }
   0x1   :  { %s907_s29 = smov 0  }
   0x2 LB: > { %s31_s30 = sadd.s32 1, %s849_s28  ;;  %p754_p0 = scmp.ge.s32.totalorder %s853_s29, 1  ;;  %s853_s29 = sphi %s907_s29, %s19_s29   ;;  %s849_s28 = sphi %s905_s28, %s1010_s28   ;;  %s845_s27 = sphi %s903_s27, %s1009_s27  }
   0x3   : > { %p33_p1 = scmp.ge.s32.totalorder %s31_s30, 2  ;;  %p293_p2 = scmp.lt.s32.totalorder %s853_s29, 3 }
   0x5   : > { %s1012_s30 = smov (%p33_p1, %s31_s30), 0  ;;  %p294_p3 = pnand %p754_p0, %p293_p2 }
   0x6   : > { %p352_p4 = scmp.lt.s32.totalorder (!%p294_p3), %s845_s27, 1  ;;  %s856_s17 = smov (!%p294_p3), 64  }
   0x7   : > { %297 = sbr.rel (%p294_p3) target bundleno = 429 (0x1ad), region = 40  ;;  %s857_s18 = smov (!%p294_p3), 96  }
   0xc   : > { %s1014_s27 = smov (!%p352_p4, %s845_s27), 1  ;;  %vm392_vm0 = vcmask 261120   ;;  %v855_v3 = vmov 32.0   ;;  %v794_v4 = vld [vmem:[%s1003_s3 + $0x8] sm:$0xff]  ;;  %v793_v8 = vld [vmem:[%s1003_s3] sm:$0xff]  ;;  %vm431_vm5 = vcmask 257024  }
   0xd   : > { %s921_s9 = sshll.u32 %s1014_s27, 2  ;;  %827 = vrcp.f32 %v855_v3  ;;  %v792_v5 = vld [vmem:[%s1003_s3 + $0x8] sm:$0xff]  ;;  %531 = vrot.lane.b32.xlu1 %v794_v4, %s856_s17  ;;  %v791_v9 = vld [vmem:[%s1003_s3] sm:$0xff] }
   0xe   : > { %s358_s12 = scalar_lea.vmem %s1000_s0, %s921_s9  ;;  %490 = vrot.lane.b32.xlu2 %v792_v5, %s857_s18  ;;  %v790_v21 = vld [vmem:[%s1003_s3 + $0x8] sm:$0xff]  ;;  %v789_v22 = vld [vmem:[%s1003_s3] sm:$0xff]  ;;  %s365_s19 = scalar_lea.vmem %s1005_s5, %s921_s9 }
   0xf   : > { %v388_v0 = vld [vmem:[%s358_s12] sm:$0xf]  ;;  %462 = vmatpush.bf16.msra.mxu0 %v790_v21  ;;  %s372_s24 = scalar_lea.vmem %s1006_s6, %s921_s9  ;;  %s379_s27 = scalar_lea.vmem %s1007_s7, %s921_s9 }
  0x10   : > { %v389_v1 = vunpack.c.l.bf16 %v388_v0  ;;  %v824_v26 = vld [vmem:[%s1004_s4] ss:$0 sm:$0xff]  ;;  %s386_s12 = scalar_lea.vmem %s1008_s8, %s921_s9 }
  0x11   : > { %v825_v27 = vld [vmem:[%s1004_s4] ss:$0 sm:$0xff] }
  0x12   : > { %v393_v2 = vsel %vm392_vm0, %v389_v1, 0.0  ;;  %v822_v36 = vld [vmem:[%s1001_s1] ss:$0 sm:$0xff] }
  0x13   : > { %394 = vadd.xlane.f32.xlu0 %v393_v2  ;;  %v828_v6 = vpop.eup %827  ;;  %463 = vmatpush.bf16.msra.mxu0 %v789_v22  ;;  %v823_v39 = vld [vmem:[%s1002_s2] ss:$0 sm:$0xff] }
  0x14   : > { %v397_v7 = vmul.f32 32.0, %v828_v6  ;;  %vm401_vm1 = vweird.f32 %v828_v6  ;;  %v826_v43 = vld [vmem:[%s1004_s4] ss:$0 sm:$0xff] }
  0x15   : > { %529 = vrot.lane.b32.xlu1 %v793_v8, %s856_s17 }
  0x16   : > { %v398_v10 = vsub.f32 1.0, %v397_v7  ;;  %488 = vrot.lane.b32.xlu2 %v791_v9, %s857_s18 }
  0x18   : > { %v399_v11 = vmul.f32 %v828_v6, %v398_v10 }
  0x1a   : > { %v400_v12 = vadd.f32 %v828_v6, %v399_v11 }
  0x1c   : > { %v402_v13 = vsel %vm401_vm1, %v828_v6, %v400_v12 }
  0x1d   : > { %535 = vrot.lane.b32.xlu1 %v825_v27, %s856_s17 }
  0x68   : > { %v491_v20 = vpop.permute.xlu2 %490 }
  0x69   : > { %503 = vmatpush.bf16.msra.mxu1 %v491_v20 }
  0x70   : > { %v489_v24 = vpop.permute.xlu2 %488 }
  0x71   : > { %504 = vmatpush.bf16.msra.mxu1 %v489_v24 }
  0x7f   : > { %v532_v19 = vpop.permute.xlu1 %531 }
  0x80   : > { %544 = vmatpush.bf16.msra.mxu2 %v532_v19 }
  0x86   : > { %v395_v14 = vpop.xlane.xlu0 %394 }
  0x87   : > { %v403_v15 = vmul.f32 %v402_v13, %v395_v14  ;;  %v530_v23 = vpop.permute.xlu1 %529 }
  0x88   : > { %545 = vmatpush.bf16.msra.mxu2 %v530_v23 }
  0x89   : > { %v404_v16 = vsub.f32 %v389_v1, %v403_v15 }
  0x8b   : > { %v405_v17 = vmul.f32 %v404_v16, %v404_v16 }
  0x8d   : > { %v406_v18 = vsel %vm392_vm0, %v405_v17, 0.0 }
  0x8e   : > { %407 = vadd.xlane.f32.xlu0 %v406_v18 }
  0x8f   : > { %v536_v51 = vpop.permute.xlu1 %535 }
  0xa2   : > { %494 = vrot.lane.b32.xlu0 %v824_v26, %s857_s18 }
 0x101   : > { %v408_v25 = vpop.xlane.xlu0 %407 }
 0x102   : > { %v409_v28 = vmul.f32 %v408_v25, %v402_v13 }
 0x104   : > { %v410_v29 = vadd.f32 1e-05, %v409_v28 }
 0x106   : > { %829 = vrsqrt.f32 %v410_v29  ;;  %vm417_vm3 = vweird.f32 %v410_v29 }
 0x10c   : > { %v830_v30 = vpop.eup %829 }
 0x10d   : > { %v412_v31 = vmul.f32 %v830_v30, %v410_v29  ;;  %vm418_vm2 = vweird.f32 %v830_v30 }
 0x10e   : > { %vm419_vm4 = vmor %vm417_vm3, %vm418_vm2 }
 0x10f   : > { %v413_v32 = vmul.f32 %v830_v30, %v412_v31 }
 0x111   : > { %v414_v33 = vmul.f32 0.5, %v413_v32 }
 0x113   : > { %v415_v34 = vsub.f32 1.5, %v414_v33 }
 0x114   : > { %v495_v44 = vpop.permute.xlu0 %494 }
 0x115   : > { %v416_v35 = vmul.f32 %v830_v30, %v415_v34 }
 0x117   : > { %v420_v37 = vsel %vm419_vm4, %v830_v30, %v416_v35 }
 0x118   : > { %v421_v38 = vmul.f32 %v420_v37, %v404_v16 }
 0x11a   : > { %v425_v40 = vmul.f32 %v822_v36, %v421_v38 }
 0x11c   : > { %v429_v41 = vadd.f32 %v823_v39, %v425_v40 }
 0x11e   : > { %v430_v42 = vpack.c.bf16 %v429_v41, %v429_v41 }
 0x120   : > { %768 = vmatmul.msk.bf16.vlgmr.msra.gmra.mxu0 %vm392_vm0, %v430_v42  ;;  %777 = vmatmul.msk.bf16.vlgmr.msra.gmra.mxu1 %vm392_vm0, %v430_v42  ;;  %432 = vst.msk [vmem:[%s365_s19] sm:$0xf] %vm431_vm5, %v430_v42 }
 0x121   : > { %786 = vmatmul.msk.bf16.vlgmr.msra.gmra.mxu2 %vm392_vm0, %v430_v42 }
 0x19d   : > { %v465_v45 = vpop.f32.mrf.mxu0  ;;  %v506_v46 = vpop.f32.mrf.mxu1 }
 0x19e   : > { %v466_v47 = vadd.f32 %v826_v43, %v465_v45  ;;  %v507_v48 = vadd.f32 %v506_v46, %v495_v44 }
 0x1a0   : > { %v469_v49 = vpack.c.bf16 %v466_v47, %v466_v47  ;;  %v510_v50 = vpack.c.bf16 %v507_v48, %v507_v48 }
 0x1a2   : > { %470 = vst.msk [vmem:[%s372_s24] sm:$0xf] %vm431_vm5, %v469_v49 }
 0x1a3   : > { %511 = vst.msk [vmem:[%s379_s27] sm:$0xf] %vm431_vm5, %v510_v50 }
 0x1a4   : > { %v547_v52 = vpop.f32.mrf.mxu2 }
 0x1a5   : > { %v548_v53 = vadd.f32 %v547_v52, %v536_v51  ;;  %v467_v54 = vpop.f32.mrf.mxu0  ;;  %v508_v55 = vpop.f32.mrf.mxu1 }
 0x1a7   : > { %v551_v56 = vpack.c.bf16 %v548_v53, %v548_v53 }
 0x1a9   : > { %552 = vst.msk [vmem:[%s386_s12] sm:$0xf] %vm431_vm5, %v551_v56 }
 0x1ac   : > { %v549_v57 = vpop.f32.mrf.mxu2 }
 0x1ad PF: > { %s19_s29 = sadd.s32 1, %s853_s29   ;;  %s1009_s27 = smov %s849_s28 }
 0x1ae   : > { %p16_p5 = scmp.ge.s32.totalorder %s19_s29, 4   ;;  %s1010_s28 = smov %s1012_s30 }
 0x1b0   :  { %18 = sbr.rel (!%p16_p5) target bundleno = 2 (0x2), region = 106 }

// kernel: gpt_forward.10
= control target key start
LH: loop header
LB: loop body
LE: loop exit
PB: predicated region body
PF: predicated region fallthrough
CT: control target
= control target key end

     0   :  { %s842_s24 = smov 0   ;;  %s844_s25 = smov 0   ;;  %s930_s0 = inlined_call_operand.vmem [shape: bf16[2,8,32], index: 0, kind: input, shape index: {}]   ;;  %s931_s1 = inlined_call_operand.vmem [shape: f32[1,32], index: 1, kind: input, shape index: {}]   ;;  %s932_s2 = inlined_call_operand.vmem [shape: f32[1,32], index: 2, kind: input, shape index: {}]   ;;  %s933_s3 = inlined_call_operand.vmem [shape: bf16[32,128], index: 3, kind: input, shape index: {}]   ;;  %s934_s4 = inlined_call_operand.vmem [shape: f32[1,128], index: 4, kind: input, shape index: {}]   ;;  %s935_s5 = inlined_call_operand.vmem [shape: bf16[128,32], index: 5, kind: input, shape index: {}]   ;;  %s936_s6 = inlined_call_operand.vmem [shape: f32[1,32], index: 6, kind: input, shape index: {}]   ;;  %s937_s7 = inlined_call_operand.vmem [shape: bf16[2,8,32], index: 7, kind: output, shape index: {}]  }
   0x1   :  { %s846_s26 = smov 0  }
   0x2 LB: > { %s36_s27 = sadd.s32 1, %s794_s25  ;;  %p684_p0 = scmp.ge.s32.totalorder %s798_s26, 1  ;;  %s798_s26 = sphi %s846_s26, %s17_s26   ;;  %s794_s25 = sphi %s844_s25, %s939_s25   ;;  %s790_s24 = sphi %s842_s24, %s938_s24  }
   0x3   : > { %p38_p1 = scmp.ge.s32.totalorder %s36_s27, 2  ;;  %p290_p2 = scmp.lt.s32.totalorder %s798_s26, 3 }
   0x5   : > { %s941_s27 = smov (%p38_p1, %s36_s27), 0  ;;  %p291_p3 = pnand %p684_p0, %p290_p2 }
   0x6   : > { %p338_p4 = scmp.lt.s32.totalorder (!%p291_p3), %s790_s24, 1 }
   0x7   : > { %294 = sbr.rel (%p291_p3) target bundleno = 590 (0x24e), region = 48 }
   0xc   : > { %s943_s24 = smov (!%p338_p4, %s790_s24), 1  ;;  %vm374_vm0 = vcmask 261120   ;;  %v800_v3 = vmov 32.0   ;;  %v731_v15 = vld [vmem:[%s933_s3 + $0x8] sm:$0xff]  ;;  %v730_v16 = vld [vmem:[%s933_s3] sm:$0xff]  ;;  %v739_v20 = vld [vmem:[%s935_s5 + $0x38] sm:$0xff] }
   0xd   : > { %s685_s28 = sshll.u32 %s943_s24, 2  ;;  %770 = vrcp.f32 %v800_v3  ;;  %446 = vmatpush.bf16.msra.mxu0 %v731_v15  ;;  %528 = vmatpush.bf16.msra.mxu1 %v739_v20  ;;  %v738_v21 = vld [vmem:[%s935_s5 + $0x30] sm:$0xff]  ;;  %v766_v28 = vld [vmem:[%s931_s1] ss:$0 sm:$0xff]  ;;  %v737_v36 = vld [vmem:[%s935_s5 + $0x28] sm:$0xff]  ;;  %v801_v42 = vmov 0.0  }
   0xe   : > { %s344_s8 = scalar_lea.vmem %s930_s0, %s685_s28  ;;  %v767_v30 = vld [vmem:[%s932_s2] ss:$0 sm:$0xff]  ;;  %v735_v38 = vld [vmem:[%s935_s5 + $0x18] sm:$0xff]  ;;  %v734_v39 = vld [vmem:[%s935_s5 + $0x10] sm:$0xff]  ;;  %413 = vst.msk [vmem:[#allocation3] sm:$0xff] %vm374_vm0, %v801_v42  ;;  %s364_s21 = scalar_lea.vmem %s937_s7, %s685_s28  ;;  %vm555_vm5 = vcmask 257024  }
   0xf   : > { %v370_v0 = vld [vmem:[%s344_s8] sm:$0xf]  ;;  %v733_v40 = vld [vmem:[%s935_s5 + $0x8] sm:$0xff] }
  0x10   : > { %v371_v1 = vunpack.c.l.bf16 %v370_v0  ;;  %v736_v37 = vld [vmem:[%s935_s5 + $0x20] sm:$0xff] }
  0x11   : > { %447 = vmatpush.bf16.msra.mxu0 %v730_v16  ;;  %529 = vmatpush.bf16.msra.mxu1 %v738_v21  ;;  %v732_v41 = vld [vmem:[%s935_s5] sm:$0xff] }
  0x12   : > { %v375_v2 = vsel %vm374_vm0, %v371_v1, 0.0  ;;  %v768_v43 = vld [vmem:[%s934_s4] ss:$0 sm:$0xff] }
  0x13   : > { %376 = vadd.xlane.f32.xlu0 %v375_v2  ;;  %v771_v4 = vpop.eup %770  ;;  %v769_v61 = vld [vmem:[%s936_s6] ss:$0 sm:$0xff] }
  0x14   : > { %v379_v5 = vmul.f32 32.0, %v771_v4  ;;  %vm383_vm1 = vweird.f32 %v771_v4 }
  0x15   : > { %530 = vmatpush.bf16.msra.mxu1 %v737_v36  ;;  %v462_v57 = vld [vmem:[#allocation3] sm:$0xff] }
  0x16   : > { %v380_v6 = vsub.f32 1.0, %v379_v5 }
  0x18   : > { %v381_v7 = vmul.f32 %v771_v4, %v380_v6 }
  0x19   : > { %531 = vmatpush.bf16.msra.mxu1 %v736_v37 }
  0x1a   : > { %v382_v8 = vadd.f32 %v771_v4, %v381_v7 }
  0x1c   : > { %v384_v9 = vsel %vm383_vm1, %v771_v4, %v382_v8 }
  0x1d   : > { %532 = vmatpush.bf16.msra.mxu1 %v735_v38 }
  0x21   : > { %533 = vmatpush.bf16.msra.mxu1 %v734_v39 }
  0x25   : > { %534 = vmatpush.bf16.msra.mxu1 %v733_v40 }
  0x29   : > { %535 = vmatpush.bf16.msra.mxu1 %v732_v41 }
  0x86   : > { %v377_v10 = vpop.xlane.xlu0 %376 }
  0x87   : > { %v385_v11 = vmul.f32 %v384_v9, %v377_v10 }
  0x89   : > { %v386_v12 = vsub.f32 %v371_v1, %v385_v11 }
  0x8b   : > { %v387_v13 = vmul.f32 %v386_v12, %v386_v12 }
  0x8d   : > { %v388_v14 = vsel %vm374_vm0, %v387_v13, 0.0 }
  0x8e   : > { %389 = vadd.xlane.f32.xlu0 %v388_v14 }
 0x101   : > { %v390_v17 = vpop.xlane.xlu0 %389 }
 0x102   : > { %v391_v18 = vmul.f32 %v390_v17, %v384_v9 }
 0x104   : > { %v392_v19 = vadd.f32 1e-05, %v391_v18 }
 0x106   : > { %772 = vrsqrt.f32 %v392_v19  ;;  %vm399_vm3 = vweird.f32 %v392_v19 }
 0x10c   : > { %v773_v22 = vpop.eup %772 }
 0x10d   : > { %v394_v23 = vmul.f32 %v773_v22, %v392_v19  ;;  %vm400_vm2 = vweird.f32 %v773_v22 }
 0x10e   : > { %vm401_vm4 = vmor %vm399_vm3, %vm400_vm2 }
 0x10f   : > { %v395_v24 = vmul.f32 %v773_v22, %v394_v23 }
 0x111   : > { %v396_v25 = vmul.f32 0.5, %v395_v24 }
 0x113   : > { %v397_v26 = vsub.f32 1.5, %v396_v25 }
 0x115   : > { %v398_v27 = vmul.f32 %v773_v22, %v397_v26 }
 0x117   : > { %v402_v29 = vsel %vm401_vm4, %v773_v22, %v398_v27 }
 0x118   : > { %v403_v31 = vmul.f32 %v402_v29, %v386_v12 }
 0x11a   : > { %v407_v32 = vmul.f32 %v766_v28, %v403_v31 }
 0x11c   : > { %v411_v33 = vadd.f32 %v767_v30, %v407_v32 }
 0x11e   : > { %412 = vst.msk [vmem:[#allocation2] sm:$0xff] %vm374_vm0, %v411_v33 }
 0x125   : > { %v414_v34 = vld [vmem:[#allocation2] sm:$0xff] }
 0x126   : > { %v415_v35 = vpack.c.bf16 %v414_v34, %v414_v34 }
 0x128   : > { %695 = vmatmul.msk.bf16.vlgmr.msra.gmra.mxu0 %vm374_vm0, %v415_v35 }
 0x1a5   : > { %v449_v44 = vpop.f32.mrf.mxu0 }
 0x1a6   : > { %v450_v45 = vadd.f32 %v768_v43, %v449_v44 }
 0x1a8   : > { %v454_v46 = vmul.f32 0.044715, %v450_v45  ;;  %v453_v53 = vmul.f32 0.5, %v450_v45 }
 0x1aa   : > { %v455_v47 = vmul.f32 %v454_v46, %v450_v45 }
 0x1ac   : > { %v456_v48 = vmul.f32 %v455_v47, %v450_v45 }
 0x1ad   : > { %v451_v49 = vpop.f32.mrf.mxu0 }
 0x1ae   : > { %v457_v50 = vadd.f32 %v456_v48, %v450_v45 }
 0x1b0   : > { %v458_v51 = vmul.f32 0.7978846, %v457_v50 }
 0x1b2   : > { %774 = vtanh.f32 %v458_v51 }
 0x1b8   : > { %v775_v52 = vpop.eup %774 }
 0x1b9   : > { %v460_v54 = vadd.f32 1.0, %v775_v52 }
 0x1bb   : > { %v461_v55 = vmul.f32 %v460_v54, %v453_v53 }
 0x1bd   : > { %v463_v56 = vpack.c.bf16 %v461_v55, %v461_v55 }
 0x1bf   : > { %536 = vmatmul.bf16.vlgmr.msra.gmra.mxu1 %v463_v56 }
 0x23c   : > { %v537_v58 = vpop.f32.mrf.mxu1 }
 0x23d   : > { %v541_v59 = vadd.f32 %v537_v58, %v462_v57 }
 0x23f   : > { %542 = vst.msk [vmem:[#allocation3] sm:$0xff] %vm374_vm0, %v541_v59 }
 0x244   : > { %v539_v60 = vpop.f32.mrf.mxu1 }
 0x246   : > { %v547_v62 = vld [vmem:[#allocation3] sm:$0xff] }
 0x247   : > { %v548_v63 = vadd.f32 %v547_v62, %v414_v34 }
 0x249   : > { %v553_v0 = vadd.f32 %v769_v61, %v548_v63 }
 0x24b   : > { %v554_v1 = vpack.c.bf16 %v553_v0, %v553_v0 }
 0x24d   : > { %556 = vst.msk [vmem:[%s364_s21] sm:$0xf] %vm555_vm5, %v554_v1 }
 0x24e PF: > { %s17_s26 = sadd.s32 1, %s798_s26   ;;  %s938_s24 = smov %s794_s25 }
 0x24f   : > { %p14_p5 = scmp.ge.s32.totalorder %s17_s26, 4   ;;  %s939_s25 = smov %s941_s27 }
 0x251   :  { %16 = sbr.rel (!%p14_p5) target bundleno = 2 (0x2), region = 95 }

// kernel: gpt_forward.9
= control target key start
LH: loop header
LB: loop body
LE: loop exit
PB: predicated region body
PF: predicated region fallthrough
CT: control target
= control target key end

     0   :  { %s1185_s21 = smov 0   ;;  %s1187_s22 = smov 0   ;;  %s1382_s0 = inlined_call_operand.vmem [shape: bf16[2,8,32], index: 0, kind: input, shape index: {}]   ;;  %s1383_s1 = inlined_call_operand.vmem [shape: bf16[2,8,32], index: 1, kind: input, shape index: {}]   ;;  %s1384_s2 = inlined_call_operand.vmem [shape: bf16[2,8,32], index: 2, kind: input, shape index: {}]   ;;  %s1385_s3 = inlined_call_operand.vmem [shape: bf16[2,8,32], index: 3, kind: input, shape index: {}]   ;;  %s1386_s4 = inlined_call_operand.vmem [shape: bf16[4,8,32], index: 4, kind: input, shape index: {}]   ;;  %s1387_s5 = inlined_call_operand.vmem [shape: f32[1,32], index: 5, kind: input, shape index: {}]   ;;  %s1388_s6 = inlined_call_operand.vmem [shape: bf16[2,8,32], index: 6, kind: output, shape index: {}]  }
   0x1   :  { %s1189_s23 = smov 0  }
   0x2 LB: > { %s35_s24 = sadd.s32 1, %s1138_s22  ;;  %p1039_p0 = scmp.ge.s32.totalorder %s1142_s23, 1  ;;  %s1142_s23 = sphi %s1189_s23, %s16_s23   ;;  %s1138_s22 = sphi %s1187_s22, %s1390_s22   ;;  %s1134_s21 = sphi %s1185_s21, %s1389_s21  }
   0x3   : > { %p37_p1 = scmp.ge.s32.totalorder %s35_s24, 2  ;;  %p279_p2 = scmp.lt.s32.totalorder %s1142_s23, 3 }
   0x5   : > { %s1392_s24 = smov (%p37_p1, %s35_s24), 0  ;;  %p280_p3 = pnand %p1039_p0, %p279_p2 }
   0x6   : > { %p334_p4 = scmp.lt.s32.totalorder (!%p280_p3), %s1134_s21, 1  ;;  %s1146_s8 = smov (!%p280_p3), 120  }
   0x7   : > { %283 = sbr.rel (%p280_p3) target bundleno = 1166 (0x48e), region = 44  ;;  %s1148_s9 = smov (!%p280_p3), 104  }
   0x8   : > { %s1149_s10 = smov (!%p280_p3), 112  }
   0xc   : > { %s1394_s21 = smov (!%p334_p4, %s1134_s21), 1  ;;  %vm385_vm0 = vcmask 64512   ;;  %vm376_vm1 = vcmask 7168   ;;  %v1144_v3 = vmov -1e+30   ;;  %v395_v4 = vlaneseq }
   0xd   : > { %s1203_s25 = sshll.u32 %s1394_s21, 2  ;;  %377 = vst.msk [vmem:[#allocation2] sm:$0xff] %vm376_vm1, %v1144_v3  ;;  %v1145_v14 = vmov 0   ;;  %v1147_v15 = vmov 0.0   ;;  %vm463_vm3 = vcmask 1043456   ;;  %vm911_vm4 = vcmask 257024  }
   0xe   : > { %s1209_s28 = scalar_lea.vmem %s1384_s2, %s1203_s25  ;;  %s1217_s7 = scalar_lea.vmem %s1383_s1, %s1203_s25  ;;  %378 = vst.msk [vmem:[#allocation2 + $0x8] sm:$0xff] %vm376_vm1, %v1144_v3  ;;  %v1225_v5 = vshrl.u32 %v395_v4, 7  ;;  %v1227_v6 = vand.u32 127, %v395_v4  ;;  %1092 = vset.pattern.permute.xlu1 %v1145_v14  ;;  %1093 = vset.pattern.permute.xlu2 %v1145_v14 }
   0xf   : > { %v405_v0 = vld [vmem:[%s1209_s28] sm:$0xf]  ;;  %379 = vst.msk [vmem:[#allocation2 + $0x10] sm:$0xff] %vm376_vm1, %v1144_v3  ;;  %1094 = vset.pattern.permute.xlu0 %v1145_v14  ;;  %s1274_s13 = scalar_lea.vmem %s1385_s3, %s1203_s25 }
  0x10   : > { %v412_v1 = vsel %vm385_vm0, %v405_v0, 0  ;;  %v404_v2 = vld [vmem:[%s1217_s7] sm:$0xf]  ;;  %380 = vst.msk [vmem:[#allocation2 + $0x18] sm:$0xff] %vm376_vm1, %v1144_v3  ;;  %vm403_vm2 = vcmp.le.s32.totalorder %v1227_v6, %v1225_v5 }
  0x11   : > { %421 = vmatpush.bf16.xpose.msra.mxu0 %v412_v1  ;;  %v484_v11 = vld [vmem:[%s1209_s28] sm:$0xf]  ;;  %381 = vst.msk [vmem:[#allocation3] sm:$0xff] %vm376_vm1, %v1147_v15 }
  0x12   : > { %v492_v12 = vunpack.c.l.b16 %v484_v11  ;;  %382 = vst.msk [vmem:[#allocation3 + $0x8] sm:$0xff] %vm376_vm1, %v1147_v15  ;;  %v672_v16 = vld [vmem:[%s1209_s28] sm:$0xf] }
  0x13   : > { %383 = vst.msk [vmem:[#allocation3 + $0x10] sm:$0xff] %vm376_vm1, %v1147_v15  ;;  %v680_v17 = vunpack.c.l.b16 %v672_v16  ;;  %v578_v18 = vld [vmem:[%s1209_s28] sm:$0xf]  ;;  %s340_s28 = scalar_lea.vmem %s1382_s0, %s1203_s25 }
  0x14   : > { %v493_v13 = vpack.c.b16 %v492_v12, %v492_v12  ;;  %384 = vst.msk [vmem:[#allocation3 + $0x18] sm:$0xff] %vm376_vm1, %v1147_v15  ;;  %v586_v20 = vunpack.c.l.b16 %v578_v18  ;;  %v577_v22 = vld [vmem:[%s1217_s7] sm:$0xf] }
  0x15   : > { %386 = vst.msk [vmem:[#allocation4] sm:$0xff] %vm385_vm0, %v1147_v15  ;;  %v681_v19 = vpack.c.b16 %v680_v17, %v680_v17  ;;  %v1252_v23 = vld [vmem:[#allocation2] sm:$0xff]  ;;  %v581_v26 = vunpack.c.l.b16 %v577_v22 }
  0x16   : > { %387 = vst.msk [vmem:[#allocation4 + $0x8] sm:$0xff] %vm385_vm0, %v1147_v15  ;;  %v587_v21 = vpack.c.b16 %v586_v20, %v586_v20  ;;  %v483_v25 = vld [vmem:[%s1217_s7] sm:$0xf] }
  0x17   : > { %388 = vst.msk [vmem:[#allocation4 + $0x10] sm:$0xff] %vm385_vm0, %v1147_v15  ;;  %682 = vrot.lane.b32.xlu2 %v681_v19, %s1148_s9  ;;  %v487_v29 = vunpack.c.l.b16 %v483_v25  ;;  %v582_v30 = vpack.c.b16 %v581_v26, %v581_v26  ;;  %v671_v32 = vld [vmem:[%s1217_s7] sm:$0xf]  ;;  %v705_v5 = vld [vmem:[#allocation2 + $0x18] sm:$0xff] }
  0x18   : > { %1045 = vmatmul.msk.bf16.vlgmr.msra.gmra.mxu0 %vm385_vm0, %v404_v2  ;;  %389 = vst.msk [vmem:[#allocation4 + $0x18] sm:$0xff] %vm385_vm0, %v1147_v15  ;;  %v675_v33 = vunpack.c.l.b16 %v671_v32  ;;  %v406_v39 = vld [vmem:[%s1274_s13] sm:$0xf]  ;;  %v611_v15 = vld [vmem:[#allocation2 + $0x10] sm:$0xff] }
  0x19   : > { %v488_v31 = vpack.c.b16 %v487_v29, %v487_v29  ;;  %v465_v40 = vsel %vm463_vm3, %v406_v39, 0  ;;  %v485_v0 = vld [vmem:[%s1274_s13] sm:$0xf] }
  0x1a   : > { %v676_v34 = vpack.c.b16 %v675_v33, %v675_v33  ;;  %474 = vmatpush.bf16.msra.mxu1 %v465_v40  ;;  %v551_v1 = vunpack.c.l.b16 %v485_v0  ;;  %v673_v4 = vld [vmem:[%s1274_s13] sm:$0xf] }
  0x1b   : > { %v579_v17 = vld [vmem:[%s1274_s13] sm:$0xf] }
  0x1c   : > { %v552_v3 = vpack.c.b16 %v551_v1, %v551_v1  ;;  %v645_v20 = vunpack.c.l.b16 %v579_v17 }
  0x1f   : > { %588 = vrot.lane.b32.xlu2 %v587_v21, %s1149_s10  ;;  %v646_v21 = vpack.c.b16 %v645_v20, %v645_v20 }
  0x27   : > { %583 = vrot.lane.b32.xlu2 %v582_v30, %s1149_s10 }
  0x71   : > { %v683_v37 = vpop.permute.xlu2 %682 }
  0x72   : > { %v688_v38 = vsel %vm385_vm0, %v683_v37, 0 }
  0x73   : > { %697 = vmatpush.bf16.xpose.msrb.mxu0 %v688_v38 }
  0x79   : > { %v589_v41 = vpop.permute.xlu2 %588 }
  0x7a   : > { %v594_v42 = vsel %vm385_vm0, %v589_v41, 0 }
  0x7b   : > { %603 = vmatpush.bf16.xpose.msrb.mxu1 %v594_v42 }
  0x81   : > { %v584_v50 = vpop.permute.xlu2 %583 }
  0x95   : > { %v423_v7 = vpop.f32.mrf.mxu0 }
  0x96   : > { %v1234_v8 = vsel %vm403_vm2, %v423_v7, -1e+30  ;;  %v739_v7 = vunpack.c.l.b16 %v673_v4 }
  0x97   : > { %v429_v9 = vsel %vm385_vm0, %v1234_v8, -inf }
  0x98   : > { %430 = vmax.xlane.f32.xlu0 %v429_v9  ;;  %v1305_v9 = vld [vmem:[#allocation2 + $0x8] sm:$0xff] }
  0x9d   : > { %v425_v10 = vpop.f32.mrf.mxu0 }
  0xac   : > { %494 = vrot.lane.b32.xlu0 %v493_v13, %s1146_s8 }
 0x10b   : > { %v431_v24 = vpop.xlane.xlu0 %430 }
 0x10c   : > { %v1257_v27 = vmax.f32 %v1252_v23, %v431_v24 }
 0x10e   : > { %v433_v28 = vsub.f32 %v1252_v23, %v1257_v27  ;;  %482 = vst.msk [vmem:[#allocation2] sm:$0xff] %vm376_vm1, %v1257_v27  ;;  %438 = vperm.xlu1 %1092, %v1257_v27  }
 0x110   : > { %v434_v24 = vmul.f32 1.442695, %v433_v28 }
 0x116   : > { %489 = vrot.lane.b32.xlu1 %v488_v31, %s1146_s8 }
 0x11e   : > { %677 = vrot.lane.b32.xlu1 %v676_v34, %s1148_s9  ;;  %v495_v35 = vpop.permute.xlu0 %494 }
 0x11f   : > { %v500_v36 = vsel %vm385_vm0, %v495_v35, 0 }
 0x120   : > { %509 = vmatpush.bf16.xpose.msra.mxu2 %v500_v36 }
 0x180   : > { %v439_v43 = vpop.permute.xlu1 %438 }
 0x181   : > { %v441_v44 = vsub.f32 %v1234_v8, %v439_v43  ;;  %v740_v8 = vpack.c.b16 %v739_v7, %v739_v7 }
 0x183   : > { %v442_v45 = vmul.f32 1.442695, %v441_v44 }
 0x185   : > { %1096 = vpow2.f32 %v442_v45 }
 0x186   : > { %1098 = vpow2.f32 %v434_v24 }
 0x188   : > { %v490_v46 = vpop.permute.xlu1 %489 }
 0x189   : > { %1047 = vmatmul.msk.bf16.vlgmr.msra.gmra.mxu2 %vm385_vm0, %v490_v46 }
 0x18b   : > { %v1097_v47 = vpop.eup %1096 }
 0x18c   : > { %v459_v48 = vpack.c.bf16 %v1097_v47, %v1097_v47  ;;  %v446_v22 = vsel %vm385_vm0, %v1097_v47, 0.0  ;;  %v1099_v25 = vpop.eup %1098 }
 0x18e   : > { %1046 = vmatmul.msk.bf16.vlgmr.msra.gmra.mxu1 %vm385_vm0, %v459_v48 }
 0x190   : > { %v678_v49 = vpop.permute.xlu1 %677 }
 0x191   : > { %1051 = vmatmul.msk.bf16.vlgmr.msrb.gmra.mxu0 %vm385_vm0, %v678_v49 }
 0x19e   : > { %1049 = vmatmul.msk.bf16.vlgmr.msrb.gmra.mxu1 %vm385_vm0, %v584_v50 }
 0x20b   : > { %v1284_v51 = vpop.f32.mrf.mxu1 }
 0x20c   : > { %v511_v52 = vpop.f32.mrf.mxu2 }
 0x20d   : > { %v515_v53 = vsel %vm403_vm2, %v511_v52, -1e+30 }
 0x20e   : > { %v699_v54 = vpop.f32.mrf.mxu0  ;;  %v518_v55 = vsel %vm385_vm0, %v515_v53, -inf }
 0x20f   : > { %v1293_v56 = vsel %vm403_vm2, %v699_v54, -1e+30  ;;  %519 = vmax.xlane.f32.xlu1 %v518_v55  ;;  %v444_v55 = vld [vmem:[#allocation3] sm:$0xff] }
 0x210   : > { %v706_v57 = vsel %vm385_vm0, %v1293_v56, -inf }
 0x211   : > { %707 = vmax.xlane.f32.xlu2 %v706_v57 }
 0x213   : > { %v478_v58 = vpop.f32.mrf.mxu1 }
 0x214   : > { %v513_v59 = vpop.f32.mrf.mxu2 }
 0x216   : > { %v701_v60 = vpop.f32.mrf.mxu0 }
 0x21b   : > { %v605_v61 = vpop.f32.mrf.mxu1 }
 0x21c   : > { %v609_v62 = vsel %vm403_vm2, %v605_v61, -1e+30 }
 0x21d   : > { %v612_v63 = vsel %vm385_vm0, %v609_v62, -inf }
 0x21e   : > { %613 = vmax.xlane.f32.xlu0 %v612_v63 }
 0x223   : > { %v607_v2 = vpop.f32.mrf.mxu1 }
 0x224   : > { %v534_v2 = vld [vmem:[#allocation3 + $0x8] sm:$0xff] }
 0x228   : > { %553 = vrot.lane.b32.xlu1 %v552_v3, %s1146_s8 }
 0x230   : > { %741 = vrot.lane.b32.xlu1 %v740_v8, %s1148_s9  ;;  %s368_s9 = scalar_lea.vmem %s1388_s6, %s1203_s25 }
 0x282   : > { %v520_v10 = vpop.xlane.xlu1 %519 }
 0x283   : > { %v1308_v6 = vmax.f32 %v1305_v9, %v520_v10 }
 0x284   : > { %v708_v11 = vpop.xlane.xlu2 %707 }
 0x285   : > { %v522_v12 = vsub.f32 %v1305_v9, %v1308_v6  ;;  %576 = vst.msk [vmem:[#allocation2 + $0x8] sm:$0xff] %vm376_vm1, %v1308_v6  ;;  %v709_v13 = vmax.f32 %v705_v5, %v708_v11  ;;  %527 = vperm.xlu2 %1093, %v1308_v6   ;;  %v628_v9 = vld [vmem:[#allocation3 + $0x10] sm:$0xff] }
 0x287   : > { %v710_v14 = vsub.f32 %v705_v5, %v709_v13  ;;  %764 = vst.msk [vmem:[#allocation2 + $0x18] sm:$0xff] %vm376_vm1, %v709_v13  ;;  %715 = vperm.xlu0 %1094, %v709_v13   ;;  %v523_v52 = vmul.f32 1.442695, %v522_v12 }
 0x289   : > { %v711_v49 = vmul.f32 1.442695, %v710_v14  ;;  %v722_v14 = vld [vmem:[#allocation3 + $0x18] sm:$0xff] }
 0x291   : > { %v614_v16 = vpop.xlane.xlu0 %613 }
 0x292   : > { %v615_v18 = vmax.f32 %v611_v15, %v614_v16 }
 0x294   : > { %v616_v19 = vsub.f32 %v611_v15, %v615_v18  ;;  %670 = vst.msk [vmem:[#allocation2 + $0x10] sm:$0xff] %vm376_vm1, %v615_v18  ;;  %621 = vperm.xlu2 %1093, %v615_v18  }
 0x29a   : > { %v554_v26 = vpop.permute.xlu1 %553 }
 0x29b   : > { %v559_v29 = vsel %vm463_vm3, %v554_v26, 0 }
 0x29c   : > { %647 = vrot.lane.b32.xlu2 %v646_v21, %s1149_s10  ;;  %568 = vmatpush.bf16.msra.mxu3 %v559_v29  ;;  %v542_v21 = vld [vmem:[#allocation4 + $0x8] sm:$0xff] }
 0x2a2   : > { %v742_v33 = vpop.permute.xlu1 %741 }
 0x2a3   : > { %v747_v34 = vsel %vm463_vm3, %v742_v33, 0 }
 0x2a4   : > { %756 = vmatpush.bf16.msrb.mxu2 %v747_v34 }
 0x2b1   : > { %447 = vadd.xlane.f32.xlu0 %v446_v22 }
 0x2c5   : > { %455 = vperm.xlu0 %1094, %v1099_v25  }
 0x2df   : > { %v528_v30 = vpop.permute.xlu2 %527 }
 0x2e0   : > { %v530_v31 = vsub.f32 %v515_v53, %v528_v30  ;;  %v617_v53 = vmul.f32 1.442695, %v616_v19  ;;  %v730_v30 = vld [vmem:[#allocation4 + $0x18] sm:$0xff] }
 0x2e2   : > { %v531_v32 = vmul.f32 1.442695, %v530_v31 }
 0x2e4   : > { %1100 = vpow2.f32 %v531_v32  ;;  %v636_v32 = vld [vmem:[#allocation4 + $0x10] sm:$0xff] }
 0x2ea   : > { %v1101_v35 = vpop.eup %1100 }
 0x2eb   : > { %v536_v36 = vsel %vm385_vm0, %v1101_v35, 0.0  ;;  %v549_v23 = vpack.c.bf16 %v1101_v35, %v1101_v35 }
 0x2ec   : > { %537 = vadd.xlane.f32.xlu1 %v536_v36 }
 0x2ed   : > { %1048 = vmatmul.msk.bf16.vlgmr.msra.gmra.mxu3 %vm385_vm0, %v549_v23 }
 0x2ee   : > { %v622_v27 = vpop.permute.xlu2 %621 }
 0x2ef   : > { %v624_v28 = vsub.f32 %v609_v62, %v622_v27  ;;  %v452_v62 = vld [vmem:[#allocation4] sm:$0xff] }
 0x2f1   : > { %v625_v37 = vmul.f32 1.442695, %v624_v28 }
 0x2f3   : > { %1102 = vpow2.f32 %v625_v37 }
 0x2f6   : > { %v648_v38 = vpop.permute.xlu2 %647 }
 0x2f7   : > { %v653_v39 = vsel %vm463_vm3, %v648_v38, 0 }
 0x2f8   : > { %662 = vmatpush.bf16.msrb.mxu3 %v653_v39 }
 0x2f9   : > { %v1103_v40 = vpop.eup %1102  ;;  %v716_v41 = vpop.permute.xlu0 %715 }
 0x2fa   : > { %v718_v42 = vsub.f32 %v1293_v56, %v716_v41  ;;  %v630_v43 = vsel %vm385_vm0, %v1103_v40, 0.0  ;;  %v643_v44 = vpack.c.bf16 %v1103_v40, %v1103_v40  ;;  %v445_v56 = vmul.f32 %v1099_v25, %v444_v55 }
 0x2fb   : > { %631 = vadd.xlane.f32.xlu1 %v630_v43  ;;  %v1054_v43 = vld [vmem:[%s1386_s4 + $0x4] sm:$0xf] }
 0x2fc   : > { %v719_v45 = vmul.f32 1.442695, %v718_v42 }
 0x2fd   : > { %1050 = vmatmul.msk.bf16.vlgmr.msrb.gmra.mxu3 %vm385_vm0, %v643_v44  ;;  %v826_v44 = vsel %vm463_vm3, %v1054_v43, 0 }
 0x2fe   : > { %1104 = vpow2.f32 %v719_v45  ;;  %835 = vmatpush.bf16.msra.mxu3 %v826_v44  ;;  %v1058_v45 = vld [vmem:[%s1386_s4 + $0xc] sm:$0xf] }
 0x2ff   : > { %1106 = vpow2.f32 %v711_v49 }
 0x300   : > { %1108 = vpow2.f32 %v523_v52 }
 0x301   : > { %1110 = vpow2.f32 %v617_v53 }
 0x304   : > { %v1105_v46 = vpop.eup %1104 }
 0x305   : > { %v724_v47 = vsel %vm385_vm0, %v1105_v46, 0.0  ;;  %v737_v48 = vpack.c.bf16 %v1105_v46, %v1105_v46  ;;  %v1107_v50 = vpop.eup %1106  ;;  %v894_v46 = vsel %vm463_vm3, %v1058_v45, 0 }
 0x306   : > { %725 = vadd.xlane.f32.xlu2 %v724_v47  ;;  %v1109_v54 = vpop.eup %1108  ;;  %v723_v16 = vmul.f32 %v1107_v50, %v722_v14  ;;  %903 = vmatpush.bf16.msra.mxu2 %v894_v46  ;;  %v1056_v47 = vld [vmem:[%s1386_s4 + $0x8] sm:$0xf] }
 0x307   : > { %1052 = vmatmul.msk.bf16.vlgmr.msrb.gmra.mxu2 %vm385_vm0, %v737_v48  ;;  %v1111_v58 = vpop.eup %1110  ;;  %v535_v3 = vmul.f32 %v1109_v54, %v534_v2  ;;  %v860_v48 = vsel %vm463_vm3, %v1056_v47, 0 }
 0x308   : > { %v629_v10 = vmul.f32 %v1111_v58, %v628_v9  ;;  %869 = vmatpush.bf16.msra.mxu0 %v860_v48 }
 0x314   : > { %733 = vperm.xlu1 %1092, %v1107_v50  }
 0x31e   : > { %545 = vperm.xlu2 %1093, %v1109_v54  }
 0x324   : > { %v448_v57 = vpop.xlane.xlu0 %447 }
 0x325   : > { %v449_v59 = vadd.f32 %v448_v57, %v445_v56 }
 0x326   : > { %639 = vperm.xlu2 %1093, %v1111_v58  }
 0x327   : > { %451 = vst.msk [vmem:[#allocation3] sm:$0xff] %vm376_vm1, %v449_v59 }
 0x32e   : > { %v775_v60 = vld [vmem:[#allocation3] sm:$0xff] }
 0x32f   : > { %1112 = vrcp.f32 %v775_v60 }
 0x335   : > { %v1113_v61 = vpop.eup %1112 }
 0x336   : > { %780 = vperm.xlu2 %1093, %v1113_v61  }
 0x337   : > { %v456_v63 = vpop.permute.xlu0 %455 }
 0x338   : > { %v458_v0 = vmul.f32 %v456_v63, %v452_v62 }
 0x33a   : > { %v480_v1 = vadd.f32 %v1284_v51, %v458_v0  ;;  %v785_v51 = vld [vmem:[%s1386_s4] sm:$0xf] }
 0x33b   : > { %v792_v13 = vsel %vm463_vm3, %v785_v51, 0 }
 0x33c   : > { %481 = vst.msk [vmem:[#allocation4] sm:$0xff] %vm385_vm0, %v480_v1  ;;  %801 = vmatpush.bf16.msra.mxu1 %v792_v13 }
 0x343   : > { %v777_v38 = vld [vmem:[#allocation4] sm:$0xff] }
 0x35f   : > { %v538_v4 = vpop.xlane.xlu1 %537 }
 0x360   : > { %v539_v7 = vadd.f32 %v538_v4, %v535_v3  ;;  %v768_v3 = vld [vmem:[%s340_s28] sm:$0xf] }
 0x361   : > { %v769_v4 = vunpack.c.l.bf16 %v768_v3 }
 0x362   : > { %540 = vst.msk [vmem:[#allocation3 + $0x8] sm:$0xff] %vm376_vm1, %v539_v7  ;;  %v1095_v7 = vld [vmem:[%s1387_s5] ss:$0 sm:$0xff] }
 0x369   : > { %v809_v8 = vld [vmem:[#allocation3 + $0x8] sm:$0xff] }
 0x36a   : > { %1114 = vrcp.f32 %v809_v8  ;;  %v774_v8 = vadd.f32 %v1095_v7, %v769_v4 }
 0x36e   : > { %v632_v5 = vpop.xlane.xlu1 %631 }
 0x36f   : > { %v633_v6 = vadd.f32 %v632_v5, %v629_v10 }
 0x370   : > { %v1115_v11 = vpop.eup %1114  ;;  %v570_v12 = vpop.f32.mrf.mxu3 }
 0x371   : > { %634 = vst.msk [vmem:[#allocation3 + $0x10] sm:$0xff] %vm376_vm1, %v633_v6  ;;  %815 = vperm.xlu0 %1094, %v1115_v11  }
 0x378   : > { %v572_v15 = vpop.f32.mrf.mxu3  ;;  %v843_v17 = vld [vmem:[#allocation3 + $0x10] sm:$0xff] }
 0x379   : > { %v726_v18 = vpop.xlane.xlu2 %725  ;;  %1116 = vrcp.f32 %v843_v17 }
 0x37a   : > { %v727_v19 = vadd.f32 %v726_v18, %v723_v16 }
 0x37c   : > { %728 = vst.msk [vmem:[#allocation3 + $0x18] sm:$0xff] %vm376_vm1, %v727_v19 }
 0x37f   : > { %v1117_v20 = vpop.eup %1116 }
 0x380   : > { %849 = vperm.xlu0 %1094, %v1117_v20   ;;  %v664_v22 = vpop.f32.mrf.mxu3 }
 0x381   : > { %v546_v24 = vpop.permute.xlu2 %545 }
 0x382   : > { %v548_v25 = vmul.f32 %v546_v24, %v542_v21 }
 0x383   : > { %v877_v26 = vld [vmem:[#allocation3 + $0x18] sm:$0xff] }
 0x384   : > { %v574_v29 = vadd.f32 %v570_v12, %v548_v25  ;;  %1118 = vrcp.f32 %v877_v26 }
 0x386   : > { %575 = vst.msk [vmem:[#allocation4 + $0x8] sm:$0xff] %vm385_vm0, %v574_v29  ;;  %v734_v31 = vpop.permute.xlu1 %733 }
 0x387   : > { %v736_v34 = vmul.f32 %v734_v31, %v730_v30 }
 0x388   : > { %v666_v33 = vpop.f32.mrf.mxu3 }
 0x389   : > { %v640_v35 = vpop.permute.xlu2 %639 }
 0x38a   : > { %v1119_v36 = vpop.eup %1118  ;;  %v642_v23 = vmul.f32 %v640_v35, %v636_v32  ;;  %v758_v27 = vpop.f32.mrf.mxu2 }
 0x38b   : > { %v762_v28 = vadd.f32 %v758_v27, %v736_v34  ;;  %883 = vperm.xlu1 %1092, %v1119_v36  }
 0x38c   : > { %v668_v37 = vadd.f32 %v664_v22, %v642_v23 }
 0x38d   : > { %763 = vst.msk [vmem:[#allocation4 + $0x18] sm:$0xff] %vm385_vm0, %v762_v28  ;;  %v812_v50 = vld [vmem:[#allocation4 + $0x8] sm:$0xff] }
 0x38e   : > { %669 = vst.msk [vmem:[#allocation4 + $0x10] sm:$0xff] %vm385_vm0, %v668_v37 }
 0x391   : > { %v781_v39 = vpop.permute.xlu2 %780 }
 0x392   : > { %v783_v40 = vmul.f32 %v781_v39, %v777_v38  ;;  %v760_v41 = vpop.f32.mrf.mxu2 }
 0x394   : > { %v784_v42 = vpack.c.bf16 %v783_v40, %v783_v40  ;;  %v880_v58 = vld [vmem:[#allocation4 + $0x18] sm:$0xff] }
 0x395   : > { %v846_v55 = vld [vmem:[#allocation4 + $0x10] sm:$0xff] }
 0x396   : > { %1053 = vmatmul.msk.bf16.vlgmr.msra.gmra.mxu1 %vm385_vm0, %v784_v42 }
 0x3e3   : > { %v816_v49 = vpop.permute.xlu0 %815 }
 0x3e4   : > { %v818_v52 = vmul.f32 %v816_v49, %v812_v50 }
 0x3e6   : > { %v819_v53 = vpack.c.bf16 %v818_v52, %v818_v52 }
 0x3e8   : > { %1055 = vmatmul.msk.bf16.vlgmr.msra.gmra.mxu3 %vm385_vm0, %v819_v53 }
 0x3f2   : > { %v850_v54 = vpop.permute.xlu0 %849 }
 0x3f3   : > { %v852_v56 = vmul.f32 %v850_v54, %v846_v55 }
 0x3f5   : > { %v853_v57 = vpack.c.bf16 %v852_v56, %v852_v56 }
 0x3f7   : > { %1057 = vmatmul.msk.bf16.vlgmr.msra.gmra.mxu0 %vm385_vm0, %v853_v57 }
 0x3fd   : > { %v884_v59 = vpop.permute.xlu1 %883 }
 0x3fe   : > { %v886_v60 = vmul.f32 %v884_v59, %v880_v58 }
 0x400   : > { %v887_v61 = vpack.c.bf16 %v886_v60, %v886_v60 }
 0x402   : > { %1059 = vmatmul.msk.bf16.vlgmr.msra.gmra.mxu2 %vm385_vm0, %v887_v61 }
 0x413   : > { %v803_v62 = vpop.f32.mrf.mxu1 }
 0x414   : > { %v807_v10 = vadd.f32 %v803_v62, %v774_v8 }
 0x41b   : > { %v805_v63 = vpop.f32.mrf.mxu1 }
 0x46b   : > { %v837_v0 = vpop.f32.mrf.mxu3 }
 0x46c   : > { %v841_v5 = vadd.f32 %v837_v0, %v807_v10 }
 0x473   : > { %v839_v1 = vpop.f32.mrf.mxu3 }
 0x474   : > { %v871_v2 = vpop.f32.mrf.mxu0 }
 0x475   : > { %v875_v6 = vadd.f32 %v871_v2, %v841_v5 }
 0x47c   : > { %v873_v9 = vpop.f32.mrf.mxu0 }
 0x485   : > { %v905_v11 = vpop.f32.mrf.mxu2 }
 0x486   : > { %v909_v12 = vadd.f32 %v905_v11, %v875_v6 }
 0x488   : > { %v910_v51 = vpack.c.bf16 %v909_v12, %v909_v12 }
 0x48a   : > { %912 = vst.msk [vmem:[%s368_s9] sm:$0xf] %vm911_vm4, %v910_v51 }
 0x48d   : > { %v907_v13 = vpop.f32.mrf.mxu2 }
 0x48e PF: > { %s16_s23 = sadd.s32 1, %s1142_s23   ;;  %s1389_s21 = smov %s1138_s22 }
 0x48f   : > { %p13_p5 = scmp.ge.s32.totalorder %s16_s23, 4   ;;  %s1390_s22 = smov %s1392_s24 }
 0x491   :  { %15 = sbr.rel (!%p13_p5) target bundleno = 2 (0x2), region = 113 }

// kernel: gpt_forward.15
= control target key start
LH: loop header
LB: loop body
LE: loop exit
PB: predicated region body
PF: predicated region fallthrough
CT: control target
= control target key end

     0   :  { %7 = vsyncpa [#allocation3], 0  ;;  %s611_s0 = inlined_call_operand.vmem [shape: bf16[2,8,32], index: 0, kind: input, shape index: {}]   ;;  %s612_s1 = inlined_call_operand.vmem [shape: bf16[32,64], index: 1, kind: input, shape index: {}]   ;;  %s613_s2 = inlined_call_operand.hbm [shape: f32[2,8,64], index: 2, kind: output, shape index: {}]  }
   0x1   :  { %9 = vsyncpa [#allocation3 + $0x1], 0  ;;  %s508_s9 = smov 0   ;;  %s510_s10 = smov 0  }
   0x2   :  { %s512_s11 = smov 0   ;;  %s514_s12 = smov 0  }
   0x3   :  { %s516_s13 = smov 0   ;;  %s518_s14 = smov 0  }
   0x4 LB: > { %s335_s15 = sadd.s32 4294967295, %s491_s14   ;;  %s336_s16 = sadd.s32 4294967294, %s491_s14   ;;  %s491_s14 = sphi %s518_s14, %s15_s14   ;;  %s487_s13 = sphi %s516_s13, %s620_s13   ;;  %s483_s12 = sphi %s514_s12, %s619_s12   ;;  %s479_s11 = sphi %s512_s11, %s618_s11   ;;  %s475_s10 = sphi %s510_s10, %s617_s10   ;;  %s471_s9 = sphi %s508_s9, %s616_s9  }
   0x5   : > { %s34_s17 = sadd.s32 1, %s487_s13  ;;  %s99_s18 = sadd.s32 1, %s479_s11 }
   0x6   : > { %p36_p0 = scmp.ge.s32.totalorder %s34_s17, 2  ;;  %p109_p1 = scmp.ne.s32.totalorder %s479_s11, %s475_s10 }
   0x7   : > { %p110_p2 = scmp.eq.s32.totalorder %s335_s15, 1  ;;  %p115_p3 = scmp.ne.s32.totalorder %s475_s10, %s471_s9 }
   0x8   : > { %s622_s17 = smov (%p36_p0, %s34_s17), 0  ;;  %p116_p5 = scmp.eq.s32.totalorder %s336_s16, 1 }
   0x9   : > { %p548_p4 = por %p110_p2, %p109_p1  ;;  %s92_s20 = ssub.s32 %s487_s13, %s622_s17 }
   0xa   : > { %p340_p6 = scmp.ge.s32.totalorder %s491_s14, 1  ;;  %p97_p7 = scmp.eq.s32.totalorder %s92_s20, 0 }
   0xb   : > { %p555_p8 = por %p116_p5, %p115_p3  ;;  %p151_p9 = scmp.lt.s32.totalorder %s491_s14, 3 }
   0xc   : > { %s561_s22 = scalar_select %p97_p7, %s479_s11, %s99_s18  }
   0xd   : > { %p152_p10 = pnand %p340_p6, %p151_p9 }
   0xe   : > { %p179_p11 = scmp.lt.s32.totalorder (!%p152_p10), %s483_s12, 1  ;;  %s176_s4 = sand.u32 (!%p152_p10), 1, %s475_s10  }
   0xf   : > { %155 = sbr.rel (%p152_p10) target bundleno = 162 (0xa2), region = 28  ;;  %s353_s5 = sshll.u32 (!%p152_p10), %s483_s12, 3 }
  0x10   : > { %s341_s6 = sshll.u32 (!%p152_p10), %s176_s4, 3  ;;  %s240_s15 = scalar_lea.hbm (!%p152_p10), %s613_s2, %s353_s5 }
  0x11   : > { %s178_s16 = scalar_lea.vmem (!%p152_p10), [#allocation2], %s341_s6  ;;  %s244_s20 = sshll.u32 (!%p152_p10), %s240_s15, 4  ;;  %s245_s20 = int_to_ptr.hbm [resolvable:$true] %s244_s20 }
  0x12   : > { %s242_s18 = sshll.u32 (!%p152_p10), %s178_s16, 4  ;;  %s228_s23 = scalar_lea.sflag (!%p152_p10), [#allocation3], %s176_s4  ;;  %s243_s18 = int_to_ptr.vmem [resolvable:$true] %s242_s18 }
  0x13   : > { %s427_s24 = sshra.s32 (!%p152_p10), %s245_s20, 4  ;;  %s428_s24 = int_to_ptr.hbm [resolvable:$true] %s427_s24 }
  0x14   : > { %v357_v0 = vld [vmem:[%s612_s1 + $0x8] sm:$0xff]  ;;  %v356_v1 = vld [vmem:[%s612_s1] sm:$0xff]  ;;  %s180_s27 = scalar_select %p179_p11, %s483_s12, 1  ;;  %vm208_vm0 = vcmask 261120   ;;  %vm225_vm1 = vcmask 523264  }
  0x15   : > { %218 = vmatpush.bf16.msra.mxu0 %v357_v0  ;;  %s429_s25 = scalar_lea.hbm %s428_s24, 8  ;;  %p434_p1 = scmp.lt.s32.totalorder %s428_s24, %s613_s2 }
  0x16   : > { %s342_s28 = sshll.u32 %s180_s27, 2  ;;  %p430_p12 = scmp.ne.s32.totalorder %s428_s24, %s429_s25 }
  0x17   : > { %s185_s3 = scalar_lea.vmem %s611_s0, %s342_s28  ;;  %s433_s27 = scalar_lea.hbm %s613_s2, 16 }
  0x18   : > { %v191_v2 = vld [vmem:[%s185_s3] sm:$0xf]  ;;  %p431_p13 = pnand %p430_p12, %p548_p4  ;;  %p435_p2 = scmp.lt.s32.totalorder %s433_s27, %s429_s25 }
  0x19   : > { %219 = vmatpush.bf16.msra.mxu0 %v356_v1 }
  0x1a   : > { %p432_p0 = pneg %p431_p13  ;;  %p436_p3 = por %p435_p2, %p434_p1 }
  0x1c   : > { %351 = vmatmul.msk.bf16.vlgmr.msra.gmra.mxu0 %vm208_vm0, %v191_v2  ;;  %p437_p5 = pnand %p436_p3, %p432_p0 }
  0x99   : > { %v221_v3 = vpop.f32.mrf.mxu0 }
  0x9a   : > { %226 = vst.msk [vmem:[%s178_s16] sm:$0xff] %vm225_vm1, %v221_v3 }
  0x9b   : > { %440 = shalt.err (!%p437_p5)
}
  0x9c   : > { %358 = dma.vmem_to_hbm [thread:$0]  (%p548_p4), %s243_s18, 128, %s245_s20, %s228_s23  }
  0xa1   : > { %v223_v4 = vpop.f32.mrf.mxu0 }
  0xa2 PF: > { %p364_p6 = scmp.ge.s32.totalorder %s491_s14, 2  ;;  %s256_s30 = sand.u32 1, %s471_s9  }
  0xa3   : > { %s257_s3 = scalar_lea.sflag [#allocation3], %s256_s30 }
  0xa4   : > { %p361_p7 = pnand %p364_p6, %p555_p8 }
  0xa6   : > { %p362_p9 = pneg %p361_p7 }
  0xa8   : > { %466 = dma.done.wait (%p362_p9), %s257_s3, 128  }
  0xa9   : > { %468 = vsyncadd (%p362_p9), %s257_s3, 4294967168  ;;  %s15_s14 = sadd.s32 1, %s491_s14   ;;  %s616_s9 = smov %s475_s10 }
  0xaa   : > { %p12_p10 = scmp.ge.s32.totalorder %s15_s14, 4   ;;  %s617_s10 = smov %s479_s11 }
  0xab   : > { %s618_s11 = smov %s561_s22  ;;  %s619_s12 = smov %s487_s13 }
  0xac   : > { %s620_s13 = smov %s622_s17  ;;  %14 = sbr.rel (!%p12_p10) target bundleno = 4 (0x4), region = 66 }
  0xb1   :  { %263 = vsyncpa [#allocation3], 1 }
  0xb2   :  { %265 = vsyncpa [#allocation3 + $0x1], 1 }

</bundles_post_ra>
